<compile_context>
chip_gen: v7x
topology: tpu7x:2x2x1
jax: 0.10.0
libtpu: 0.0.40
codegen_flags: <defaults>
</compile_context>

<pallas_src>
import jax
import jax.numpy as jnp
from jax.experimental import pallas as pl
from jax.experimental.pallas import tpu as pltpu

LANE = 128


def _round_up(x, m):
    return (x + m - 1) // m * m


def _clip_kernel(x_ref, wl_ref, bl_ref, wp_ref, bp_ref, logits_ref, embed_ref):
    # Linear #1: embed = x @ W_lin (pre-transposed) + b_lin, f32 accumulation.
    embed_f32 = jnp.dot(x_ref[...], wl_ref[...],
                        preferred_element_type=jnp.float32) + bl_ref[...]
    embed_ref[...] = embed_f32.astype(embed_ref.dtype)
    # Linear #2 (fused): logits = embed @ W_proj + b_proj over the lane-padded
    # class dim; matmul in the weight dtype (bf16 on v6e/v7x), f32 accumulation.
    logits_f32 = jnp.dot(embed_f32.astype(wp_ref.dtype), wp_ref[...],
                         preferred_element_type=jnp.float32) + bp_ref[...]
    logits_ref[...] = logits_f32.astype(logits_ref.dtype)


def prepare_clip_params(w_lin, b_lin, w_proj, b_proj, compute_dtype=jnp.float32):
    """One-time parameter prep, hoisted out of the forward hot path.

    - transpose PyTorch (out, in) Linear weights to (in, out)
    - pad the num_classes dim up to a lane-dense multiple of 128
    - cast weights to the compute dtype (bf16 on v6e/v7x, f32 otherwise);
      biases stay f32 (added after f32 accumulation).
    """
    H, C_in = w_lin.shape
    C = w_proj.shape[0]
    C_pad = _round_up(C, LANE)

    wl_t = jnp.asarray(w_lin).T.astype(compute_dtype)                  # (C_in, H)
    wp_t = jnp.zeros((H, C_pad), compute_dtype).at[:, :C].set(
        jnp.asarray(w_proj).T.astype(compute_dtype))                   # (H, C_pad)
    bl2 = jnp.asarray(b_lin).reshape(1, H).astype(jnp.float32)         # (1, H)
    bp2 = jnp.zeros((1, C_pad), jnp.float32).at[:, :C].set(
        jnp.asarray(b_proj).astype(jnp.float32))                       # (1, C_pad)
    return dict(wl_t=wl_t, bl2=bl2, wp_t=wp_t, bp2=bp2,
                num_classes=C, compute_dtype=compute_dtype)


def clip_forward_pallas(x_embed, params, tile_b=128):
    """Fused lin -> project forward. Returns the same 4-tuple as CLIP.forward."""
    wl_t, bl2 = params["wl_t"], params["bl2"]
    wp_t, bp2 = params["wp_t"], params["bp2"]
    C = params["num_classes"]
    compute_dtype = params["compute_dtype"]

    B, C_in = x_embed.shape
    H = wl_t.shape[1]
    C_pad = wp_t.shape[1]

    # Batch tile: multiple of the sublane tile (16 for bf16 packing, 8 for f32).
    sub = 16 if compute_dtype == jnp.bfloat16 else 8
    tb = _round_up(min(tile_b, B), sub)
    b_pad = _round_up(B, tb)

    x = x_embed.astype(compute_dtype)
    if b_pad != B:
        x = jnp.pad(x, ((0, b_pad - B), (0, 0)))

    grid = (b_pad // tb,)
    itemsize = jnp.dtype(compute_dtype).itemsize
    flops = 2 * b_pad * (C_in * H + H * C_pad)
    bytes_accessed = (x.size * itemsize + wl_t.size * itemsize + wp_t.size * itemsize
                      + bl2.size * 4 + bp2.size * 4
                      + b_pad * H * 4 + b_pad * C_pad * 4)

    # Per-step VMEM: resident weights/biases + double-buffered activation tiles.
    vmem_needed = ((wl_t.size + wp_t.size) * itemsize
                   + (bl2.size + bp2.size) * 4
                   + 2 * tb * C_in * itemsize          # x tile, double-buffered
                   + 2 * tb * (H + C_pad) * 4)         # embed + logits tiles
    vmem_limit = int(min(32 * 2**20, max(2 * vmem_needed, 16 * 2**20)))

    logits_pad, embed_pad = pl.pallas_call(
        _clip_kernel,
        out_shape=(
            jax.ShapeDtypeStruct((b_pad, C_pad), jnp.float32),
            jax.ShapeDtypeStruct((b_pad, H), jnp.float32),
        ),
        grid_spec=pltpu.PrefetchScalarGridSpec(
            num_scalar_prefetch=0,
            grid=grid,
            in_specs=[
                pl.BlockSpec((tb, C_in), lambda i: (i, 0)),   # activations: tiled over B
                pl.BlockSpec((C_in, H), lambda i: (0, 0)),    # weights: resident
                pl.BlockSpec((1, H), lambda i: (0, 0)),
                pl.BlockSpec((H, C_pad), lambda i: (0, 0)),
                pl.BlockSpec((1, C_pad), lambda i: (0, 0)),
            ],
            out_specs=(
                pl.BlockSpec((tb, C_pad), lambda i: (i, 0)),  # lane-dense logits
                pl.BlockSpec((tb, H), lambda i: (i, 0)),
            ),
        ),
        compiler_params=pltpu.CompilerParams(
            dimension_semantics=("parallel",),  # independent batch tiles -> v7x megacore
            vmem_limit_bytes=vmem_limit,
        ),
        cost_estimate=pl.CostEstimate(
            flops=flops, transcendentals=0, bytes_accessed=bytes_accessed),
    )(x, wl_t, bl2, wp_t, bp2)

    logits = logits_pad[:B, :C]
    embed = embed_pad[:B, :H]

    # adv=[] in the default module -> no adversarial classifier heads.
    # TODO(synk): adv heads (nn.ModuleList of Linear(512, cls)) could be fused the
    # same way as `project`; not instantiated for the default adv=[].
    adv_outputs = []
    # Mirror: (project(embed), [0, 0, 0, embed.unsqueeze(-1).unsqueeze(-1)], embed, adv)
    return (logits, [0, 0, 0, embed[..., None, None]], embed, adv_outputs)


if __name__ == "__main__":
    # Module-native feature dims (in_channels=512 -> hidden 512 -> 3 classes),
    # small batch chosen so the batch grid takes >1 step.
    B = 24
    C_IN = 512
    H = 512
    NUM_CLASSES = 3

    key = jax.random.PRNGKey(0)
    k_x, k_wl, k_bl, k_wp, k_bp = jax.random.split(key, 5)

    x = jax.random.normal(k_x, (B, C_IN), dtype=jnp.float32)
    # PyTorch Linear weight convention: (out, in).
    w_lin = jax.random.normal(k_wl, (H, C_IN), dtype=jnp.float32) * 0.02
    b_lin = jax.random.normal(k_bl, (H,), dtype=jnp.float32) * 0.02
    w_proj = jax.random.normal(k_wp, (NUM_CLASSES, H), dtype=jnp.float32) * 0.02
    b_proj = jax.random.normal(k_bp, (NUM_CLASSES,), dtype=jnp.float32) * 0.02

    # Pure-JAX reference.
    embed_ref = x @ w_lin.T + b_lin
    logits_ref = embed_ref @ w_proj.T + b_proj

    # --- f32 path (strict check); tiny batch tile to exercise the grid (3 steps) ---
    params_f32 = prepare_clip_params(w_lin, b_lin, w_proj, b_proj, jnp.float32)
    logits, aux_list, embed, adv_outputs = clip_forward_pallas(x, params_f32, tile_b=8)
    jax.block_until_ready(logits)
    jax.block_until_ready(embed)
    assert logits.shape == (B, NUM_CLASSES)
    assert embed.shape == (B, H)
    assert jnp.allclose(embed, embed_ref, atol=1e-4, rtol=1e-4)
    assert jnp.allclose(logits, logits_ref, atol=1e-4, rtol=1e-4)
    assert aux_list[:3] == [0, 0, 0]
    assert aux_list[3].shape == (B, H, 1, 1)
    assert adv_outputs == []

    # --- bf16-in / f32-accumulate fast path (v6e/v7x), looser tolerance.
    # Also exercises batch padding to the 16-row bf16 sublane tile (24 -> 32). ---
    params_bf16 = prepare_clip_params(w_lin, b_lin, w_proj, b_proj, jnp.bfloat16)
    logits_bf, _, embed_bf, _ = clip_forward_pallas(x, params_bf16, tile_b=16)
    jax.block_until_ready(logits_bf)
    assert logits_bf.shape == (B, NUM_CLASSES)
    assert jnp.allclose(embed_bf, embed_ref, atol=5e-2, rtol=5e-2)
    assert jnp.allclose(logits_bf, logits_ref, atol=5e-2, rtol=5e-2)

    print("KERNEL_OK")
</pallas_src>

<mosaic_0001>
module attributes {stable_mosaic.version = 11 : i64} {
  func.func @_clip_kernel(%arg0: i32, %arg1: memref<8x512xf32, #tpu.memory_space<vmem>>, %arg2: memref<512x512xf32, #tpu.memory_space<vmem>>, %arg3: memref<1x512xf32, #tpu.memory_space<vmem>>, %arg4: memref<512x128xf32, #tpu.memory_space<vmem>>, %arg5: memref<1x128xf32, #tpu.memory_space<vmem>>, %arg6: memref<8x128xf32, #tpu.memory_space<vmem>>, %arg7: memref<8x512xf32, #tpu.memory_space<vmem>>) attributes {dimension_semantics = [#tpu.dimension_semantics<parallel>], iteration_bounds = array<i64: 3>, scalar_prefetch = 0 : i64, scratch_operands = 0 : i64, tpu.core_type = #tpu.core_type<tc>, window_params = [{transform_indices = @transform_0, window_bounds = array<i64: 8, 512>}, {pipeline_mode = #tpu.pipeline_mode<synchronous>, transform_indices = @transform_1, window_bounds = array<i64: 512, 512>}, {pipeline_mode = #tpu.pipeline_mode<synchronous>, transform_indices = @transform_2, window_bounds = array<i64: 1, 512>}, {pipeline_mode = #tpu.pipeline_mode<synchronous>, transform_indices = @transform_3, window_bounds = array<i64: 512, 128>}, {pipeline_mode = #tpu.pipeline_mode<synchronous>, transform_indices = @transform_4, window_bounds = array<i64: 1, 128>}, {transform_indices = @transform_5, window_bounds = array<i64: 8, 128>}, {transform_indices = @transform_6, window_bounds = array<i64: 8, 512>}]} {
    %c0 = arith.constant 0 : index
    %c0_0 = arith.constant 0 : index
    %0 = vector.load %arg1[%c0, %c0_0] : memref<8x512xf32, #tpu.memory_space<vmem>>, vector<8x512xf32>
    %c0_1 = arith.constant 0 : index
    %c0_2 = arith.constant 0 : index
    %1 = vector.load %arg2[%c0_1, %c0_2] : memref<512x512xf32, #tpu.memory_space<vmem>>, vector<512x512xf32>
    %cst = arith.constant dense<0.000000e+00> : vector<8x512xf32>
    %2 = tpu.matmul %0, %1, %cst {dimension_numbers = #tpu.dot_dimension_numbers<[1], [0], [0], [1], [0, 0, 1, 1], [], []>} : vector<8x512xf32>, vector<512x512xf32>, vector<8x512xf32> -> vector<8x512xf32>
    %c0_3 = arith.constant 0 : index
    %c0_4 = arith.constant 0 : index
    %3 = vector.load %arg3[%c0_3, %c0_4] : memref<1x512xf32, #tpu.memory_space<vmem>>, vector<1x512xf32>
    %4 = vector.broadcast %3 : vector<1x512xf32> to vector<8x512xf32>
    %5 = arith.addf %2, %4 : vector<8x512xf32>
    %c0_5 = arith.constant 0 : index
    %c0_6 = arith.constant 0 : index
    %6 = vector.load %arg7[%c0_5, %c0_6] : memref<8x512xf32, #tpu.memory_space<vmem>>, vector<8x512xf32>
    tpu.vector_store %arg7[%c0_5, %c0_6], %5 {strides = array<i32>} : memref<8x512xf32, #tpu.memory_space<vmem>>, vector<8x512xf32>,
    %c0_7 = arith.constant 0 : index
    %c0_8 = arith.constant 0 : index
    %7 = vector.load %arg4[%c0_7, %c0_8] : memref<512x128xf32, #tpu.memory_space<vmem>>, vector<512x128xf32>
    %cst_9 = arith.constant dense<0.000000e+00> : vector<8x128xf32>
    %8 = tpu.matmul %5, %7, %cst_9 {dimension_numbers = #tpu.dot_dimension_numbers<[1], [0], [0], [1], [0, 0, 1, 1], [], []>} : vector<8x512xf32>, vector<512x128xf32>, vector<8x128xf32> -> vector<8x128xf32>
    %c0_10 = arith.constant 0 : index
    %c0_11 = arith.constant 0 : index
    %9 = vector.load %arg5[%c0_10, %c0_11] : memref<1x128xf32, #tpu.memory_space<vmem>>, vector<1x128xf32>
    %10 = vector.broadcast %9 : vector<1x128xf32> to vector<8x128xf32>
    %11 = arith.addf %8, %10 : vector<8x128xf32>
    %c0_12 = arith.constant 0 : index
    %c0_13 = arith.constant 0 : index
    %12 = vector.load %arg6[%c0_12, %c0_13] : memref<8x128xf32, #tpu.memory_space<vmem>>, vector<8x128xf32>
    tpu.vector_store %arg6[%c0_12, %c0_13], %11 {strides = array<i32>} : memref<8x128xf32, #tpu.memory_space<vmem>>, vector<8x128xf32>,
    return
  }
  func.func @transform_0(%arg0: i32) -> (i32, i32) {
    %c0_i32 = arith.constant 0 : i32
    %c0_i32_0 = arith.constant 0 : i32
    return %arg0, %c0_i32 : i32, i32
  }
  func.func @transform_1(%arg0: i32) -> (i32, i32) {
    %c0_i32 = arith.constant 0 : i32
    %c0_i32_0 = arith.constant 0 : i32
    %c0_i32_1 = arith.constant 0 : i32
    return %c0_i32, %c0_i32_0 : i32, i32
  }
  func.func @transform_2(%arg0: i32) -> (i32, i32) {
    %c0_i32 = arith.constant 0 : i32
    %c0_i32_0 = arith.constant 0 : i32
    %c0_i32_1 = arith.constant 0 : i32
    return %c0_i32, %c0_i32_0 : i32, i32
  }
  func.func @transform_3(%arg0: i32) -> (i32, i32) {
    %c0_i32 = arith.constant 0 : i32
    %c0_i32_0 = arith.constant 0 : i32
    %c0_i32_1 = arith.constant 0 : i32
    return %c0_i32, %c0_i32_0 : i32, i32
  }
  func.func @transform_4(%arg0: i32) -> (i32, i32) {
    %c0_i32 = arith.constant 0 : i32
    %c0_i32_0 = arith.constant 0 : i32
    %c0_i32_1 = arith.constant 0 : i32
    return %c0_i32, %c0_i32_0 : i32, i32
  }
  func.func @transform_5(%arg0: i32) -> (i32, i32) {
    %c0_i32 = arith.constant 0 : i32
    %c0_i32_0 = arith.constant 0 : i32
    return %arg0, %c0_i32 : i32, i32
  }
  func.func @transform_6(%arg0: i32) -> (i32, i32) {
    %c0_i32 = arith.constant 0 : i32
    %c0_i32_0 = arith.constant 0 : i32
    return %arg0, %c0_i32 : i32, i32
  }
}

</mosaic_0001>

<bundles_post_ra>
// kernel: tpu_custom_call.1
= control target key start
LH: loop header
LB: loop body
LE: loop exit
PB: predicated region body
PF: predicated region fallthrough
CT: control target
= control target key end

     0   :  { %12 = vsyncpa [#allocation3], 0  ;;  %s2237_s0 = inlined_call_operand.hbm [shape: f32[24,512], index: 0, kind: input, shape index: {}]   ;;  %s2238_s1 = inlined_call_operand.hbm [shape: f32[512,512], index: 1, kind: input, shape index: {}]   ;;  %s2239_s2 = inlined_call_operand.vmem [shape: f32[1,512], index: 2, kind: input, shape index: {}]   ;;  %s2240_s3 = inlined_call_operand.hbm [shape: f32[512,128], index: 3, kind: input, shape index: {}]   ;;  %s2241_s4 = inlined_call_operand.vmem [shape: f32[1,128], index: 4, kind: input, shape index: {}]   ;;  %s2242_s5 = inlined_call_operand.hbm [shape: f32[24,128], index: 5, kind: output, shape index: {0}]   ;;  %s2243_s6 = inlined_call_operand.hbm [shape: f32[24,512], index: 6, kind: output, shape index: {1}]  }
   0x1   :  { %14 = vsyncpa [#allocation3 + $0x1], 0 }
   0x2   :  { %15 = vsyncpa [#allocation6], 0 }
   0x3   :  { %16 = vsyncpa [#allocation4], 0 }
   0x4   :  { %18 = vsyncpa [#allocation4 + $0x1], 0 }
   0x5   :  { %19 = vsyncpa [#allocation10], 0 }
   0x6   :  { %21 = vsyncpa [#allocation10 + $0x1], 0  ;;  %s1976_s21 = smov 0   ;;  %s1978_s22 = smov 0  }
   0x7   :  { %s1980_s23 = smov 0   ;;  %s1982_s24 = smov 0  }
   0x8 LB: > { %s1997_s25 = sadd.s32 4294967295, %s1930_s24   ;;  %s1244_s26 = sadd.s32 4294967294, %s1930_s24   ;;  %s1930_s24 = sphi %s1982_s24, %s2262_s24   ;;  %s1926_s23 = sphi %s1980_s23, %s2261_s23   ;;  %s1922_s22 = sphi %s1978_s22, %s2260_s22   ;;  %s1918_s21 = sphi %s1976_s21, %s2259_s21  }
   0x9   : > { %p47_p0 = scmp.ne.s32.totalorder %s1922_s22, %s1918_s21  ;;  %p2244_p1 = scmp.eq.s32.totalorder %s1997_s25, 0 }
   0xa   : > { %p161_p3 = scmp.eq.s32.totalorder %s1244_s26, 2  ;;  %p1245_p5 = scmp.ge.s32.totalorder %s1930_s24, 1 }
   0xb   : > { %p2006_p4 = por %p2244_p1, %p47_p0  ;;  %p194_p7 = scmp.lt.s32.totalorder %s1930_s24, 4 }
   0xc   : > { %p2011_p6 = por %p161_p3, %p47_p0  ;;  %s1932_s30 = smov [#allocation5]  }
   0xd   : > { %s2247_s27 = scalar_select %p2006_p4, 1, 0 }
   0xe   : > { %s2248_s28 = scalar_select %p2011_p6, 1, 0 }
   0xf   : > { %p2016_p8 = pnand %p1245_p5, %p194_p7  ;;  %s206_s7 = sshll.u32 %s1932_s30, 4  ;;  %s207_s7 = int_to_ptr.vmem [resolvable:$true] %s206_s7 }
  0x10   : > { %s1933_s9 = smov [#allocation7]   ;;  %s1742_s13 = scalar_lea.hbm %s2238_s1, 32768 }
  0x11   : > { %s2249_s29 = scalar_select %p2016_p8, 1, 0 }
  0x12   : > { %p1680_p9 = pneg %p2016_p8  ;;  %s222_s10 = sshll.u32 %s1933_s9, 4  ;;  %s2028_s10 = int_to_ptr.vmem [resolvable:$true] %s222_s10 }
  0x13   : > { %p1743_p11 = scmp.ne.s32.totalorder %s2238_s1, %s1742_s13  ;;  %p1749_p3 = scmp.lt.u32.totalorder %s1742_s13, %s2238_s1 }
  0x14   : > { %p2024_p10 = pnand %p1680_p9, %p2244_p1 }
  0x16   : > { %p1744_p12 = pneg %p2024_p10 }
  0x18   : > { %p1745_p13 = pnand %p1744_p12, %p1743_p11 }
  0x1a   : > { %p1746_p0 = pneg %p1745_p13 }
  0x1c   : > { %p1751_p5 = pnand %p1749_p3, %p1746_p0 }
  0x1e   : > { %1754 = shalt.err (!%p1751_p5)
}
  0x1f   : > { %s1755_s18 = scalar_lea.vmem %s207_s7, 32768  ;;  %p1763_p2 = scmp.lt.s32.totalorder %s207_s7, %s207_s7 }
  0x20   : > { %p1756_p7 = scmp.ne.s32.totalorder %s207_s7, %s1755_s18  ;;  %p1764_p6 = scmp.lt.s32.totalorder %s1755_s18, %s1755_s18 }
  0x22   : > { %p1758_p9 = pnand %p1756_p7, %p1744_p12  ;;  %p1765_p4 = por %p1764_p6, %p1763_p2 }
  0x24   : > { %p1759_p1 = pneg %p1758_p9 }
  0x26   : > { %p1766_p8 = pnand %p1765_p4, %p1759_p1 }
  0x28   : > { %1769 = shalt.err (!%p1766_p8)
}
  0x29   : > { %s1934_s19 = smov 512   ;;  %s1935_s20 = smov 32  }
  0x2a   : > { %1683 = dma.hbm_to_vmem [thread:$0]  (!%p2024_p10), %s2238_s1, 32768, %s207_s7, [#allocation6], %s1934_s19, %s1934_s19, %s1935_s20  }
  0x2b   : > { %s1770_s12 = scalar_lea.hbm %s2240_s3, 8192 }
  0x2c   : > { %p1771_p11 = scmp.ne.s32.totalorder %s2240_s3, %s1770_s12  ;;  %p1777_p4 = scmp.lt.u32.totalorder %s1770_s12, %s2240_s3 }
  0x2e   : > { %p1773_p1 = pnand %p1771_p11, %p1744_p12 }
  0x30   : > { %p1774_p2 = pneg %p1773_p1 }
  0x32   : > { %p1779_p6 = pnand %p1777_p4, %p1774_p2 }
  0x34   : > { %1782 = shalt.err (!%p1779_p6)
}
  0x35   : > { %s1783_s7 = scalar_lea.vmem %s2028_s10, 8192  ;;  %p1791_p3 = scmp.lt.s32.totalorder %s2028_s10, %s2028_s10 }
  0x36   : > { %p1784_p8 = scmp.ne.s32.totalorder %s2028_s10, %s1783_s7  ;;  %p1792_p5 = scmp.lt.s32.totalorder %s1783_s7, %s1783_s7 }
  0x38   : > { %p1786_p13 = pnand %p1784_p8, %p1744_p12  ;;  %p1793_p7 = por %p1792_p5, %p1791_p3 }
  0x3a   : > { %p1787_p0 = pneg %p1786_p13 }
  0x3c   : > { %p1794_p9 = pnand %p1793_p7, %p1787_p0 }
  0x3e   : > { %1797 = shalt.err (!%p1794_p9)
}
  0x3f   : > { %s1936_s17 = smov 128   ;;  %s1937_s18 = smov 8  }
  0x40   : > { %1686 = dma.hbm_to_vmem [thread:$0]  (!%p2024_p10), %s2240_s3, 8192, %s2028_s10, [#allocation6], %s1936_s17, %s1936_s17, %s1937_s18  }
  0x41   : > { %s2078_s26 = sadd.s32 1, %s1930_s24   ;;  %s34_s9 = sadd.s32 1, %s1926_s23 }
  0x42   : > { %s31_s30 = ssub.s32 %s1930_s24, %s2078_s26  ;;  %p41_p11 = scmp.ne.s32.totalorder %s1926_s23, %s1922_s22 }
  0x43   : > { %p32_p12 = scmp.eq.s32.totalorder %s31_s30, 0  ;;  %p42_p1 = scmp.eq.s32.totalorder %s1930_s24, 0 }
  0x44   : > { %p2251_p4 = scmp.eq.s32.totalorder %s1997_s25, 2  ;;  %p1700_p8 = scmp.lt.s32.totalorder %s1930_s24, 3 }
  0x45   : > { %s2087_s11 = scalar_select %p32_p12, %s1926_s23, %s34_s9  }
  0x46   : > { %p43_p2 = por %p42_p1, %p41_p11  ;;  %p2091_p6 = por %p2251_p4, %p41_p11 }
  0x47   : > { %s239_s8 = sand.u32 1, %s1926_s23   ;;  %s1266_s10 = sshll.u32 %s1930_s24, 9 }
  0x48   : > { %s1249_s13 = sshll.u32 %s239_s8, 5  ;;  %s2101_s16 = scalar_lea.hbm %s2237_s0, %s1266_s10 }
  0x49   : > { %s243_s7 = scalar_lea.vmem [#allocation2], %s1249_s13  ;;  %p2105_p10 = pnand %p1700_p8, %p43_p2 }
  0x4a   : > { %s251_s17 = sshll.u32 %s243_s7, 4  ;;  %s240_s19 = scalar_lea.sflag [#allocation3], %s239_s8  ;;  %s2103_s17 = int_to_ptr.vmem [resolvable:$true] %s251_s17 }
  0x4b   : > { %s1798_s20 = scalar_lea.hbm %s2101_s16, 512  ;;  %p1800_p0 = pneg %p2105_p10 }
  0x4c   : > { %p1799_p13 = scmp.ne.s32.totalorder %s2101_s16, %s1798_s20  ;;  %s1803_s13 = scalar_lea.hbm %s2237_s0, 1536 }
  0x4d   : > { %p1804_p7 = scmp.lt.u32.totalorder %s2101_s16, %s2237_s0  ;;  %p1805_p9 = scmp.lt.u32.totalorder %s1803_s13, %s1798_s20 }
  0x4e   : > { %p1801_p3 = pnand %p1800_p0, %p1799_p13  ;;  %p1807_p11 = scmp.lt.u32.totalorder %s1798_s20, %s2101_s16 }
  0x4f   : > { %p1806_p12 = por %p1805_p9, %p1804_p7 }
  0x50   : > { %p1802_p5 = pneg %p1801_p3 }
  0x51   : > { %p1808_p1 = por %p1807_p11, %p1806_p12 }
  0x53   : > { %p1809_p2 = pnand %p1808_p1, %p1802_p5 }
  0x55   : > { %1812 = shalt.err (!%p1809_p2)
}
  0x56   : > { %s1813_s8 = scalar_lea.vmem %s2103_s17, 512  ;;  %s1938_s15 = smov [#allocation2]  }
  0x57   : > { %p1814_p4 = scmp.ne.s32.totalorder %s2103_s17, %s1813_s8  ;;  %s1818_s7 = sshll.u32 %s1938_s15, 4  ;;  %s1819_s7 = int_to_ptr.vmem [resolvable:$false] %s1818_s7 }
  0x58   : > { %s1820_s30 = scalar_lea.vmem %s1819_s7, 1024  ;;  %p1821_p3 = scmp.lt.s32.totalorder %s2103_s17, %s1819_s7 }
  0x59   : > { %p1816_p8 = pnand %p1814_p4, %p1800_p0  ;;  %p1822_p7 = scmp.lt.s32.totalorder %s1820_s30, %s1813_s8 }
  0x5b   : > { %p1817_p13 = pneg %p1816_p8  ;;  %p1823_p9 = por %p1822_p7, %p1821_p3 }
  0x5d   : > { %p1824_p12 = pnand %p1823_p9, %p1817_p13 }
  0x5f   : > { %1827 = shalt.err (!%p1824_p12)
}
  0x60   : > { %1690 = dma.hbm_to_vmem [thread:$0]  (!%p2105_p10), %s2101_s16, 512, %s2103_s17, %s240_s19  }
  0x61   : > { %p2254_p5 = scmp.ne.s32.totalorder %s2249_s29, 0 }
  0x62   : > { %s2137_s20 = sand.u32 (!%p2254_p5), 1, %s1922_s22   ;;  %p2255_p0 = scmp.ne.s32.totalorder (!%p2254_p5), %s2247_s27, 0 }
  0x63   : > { %260 = sbr.rel (%p2254_p5) target bundleno = 691 (0x2b3), region = 40  ;;  %s1253_s9 = sshll.u32 (!%p2254_p5), %s2137_s20, 5 }
  0x64   : > { %s263_s13 = scalar_lea.sflag (!%p2254_p5), [#allocation3], %s2137_s20  ;;  %s2143_s10 = scalar_lea.vmem (!%p2254_p5), [#allocation2], %s1253_s9 }
  0x6a   : > { %1901 = dma.done.wait (%p2255_p0), %s263_s13, 512  }
  0x6b   : > { %1903 = vsyncadd (%p2255_p0), %s263_s13, 4294966784  ;;  %p2256_p10 = scmp.eq.s32.totalorder %s1997_s25, 0 }
  0x6d   : > { %1905 = dma.done.wait (%p2256_p10), [#allocation6], 40960   ;;  %p2257_p11 = pmov %p2256_p10 }
  0x6e   : > { %v313_v0 = vld [vmem:[#allocation5 + $0x8] sm:$0xff]  ;;  %v315_v2 = vld [vmem:[#allocation5 + $0x18] sm:$0xff]  ;;  %v312_v5 = vld [vmem:[#allocation5] sm:$0xff]  ;;  %s307_s16 = scalar_lea.vmem [#allocation9], %s1253_s9  ;;  %s1267_s17 = sshll.u32 %s1997_s25, 9 }
  0x6f   : > { %1907 = vsyncadd (%p2257_p11), [#allocation6], 4294926336  ;;  %v317_v1 = vld [vmem:[#allocation5 + $0x28] sm:$0xff]  ;;  %v319_v4 = vld [vmem:[#allocation5 + $0x38] sm:$0xff]  ;;  %s1123_s18 = sshll.u32 %s307_s16, 4  ;;  %s2166_s8 = scalar_lea.hbm %s2243_s6, %s1267_s17  ;;  %s1124_s18 = int_to_ptr.vmem [resolvable:$true] %s1123_s18 }
  0x70   : > { %v1338_v3 = vpack.c.bf16 %v317_v1, %v313_v0  ;;  %v316_v6 = vld [vmem:[#allocation5 + $0x20] sm:$0xff]  ;;  %v1466_v7 = vpack.c.bf16 %v319_v4, %v315_v2  ;;  %v314_v9 = vld [vmem:[#allocation5 + $0x10] sm:$0xff]  ;;  %v321_v11 = vld [vmem:[#allocation5 + $0x48] sm:$0xff]  ;;  %s1096_s15 = scalar_lea.sflag [#allocation10], %s2137_s20  ;;  %s1828_s7 = scalar_lea.vmem %s1124_s18, 512 }
  0x71   : > { %v1340_v8 = vpack.c.bf16 %v316_v6, %v312_v5  ;;  %v318_v10 = vld [vmem:[#allocation5 + $0x30] sm:$0xff]  ;;  %v325_v13 = vld [vmem:[#allocation5 + $0x68] sm:$0xff]  ;;  %v323_v14 = vld [vmem:[#allocation5 + $0x58] sm:$0xff]  ;;  %p1829_p1 = scmp.ne.s32.totalorder %s1124_s18, %s1828_s7  ;;  %s1939_s30 = smov [#allocation9]  }
  0x72   : > { %1339 = vmatprep.subr.bf16.mxu0 %v1338_v3  ;;  %v1468_v12 = vpack.c.bf16 %v318_v10, %v314_v9  ;;  %v327_v15 = vld [vmem:[#allocation5 + $0x78] sm:$0xff]  ;;  %1467 = vmatprep.subr.bf16.mxu1 %v1466_v7  ;;  %v1342_v16 = vpack.c.bf16 %v325_v13, %v321_v11  ;;  %v320_v18 = vld [vmem:[#allocation5 + $0x40] sm:$0xff]  ;;  %v322_v20 = vld [vmem:[#allocation5 + $0x50] sm:$0xff]  ;;  %s1832_s9 = sshll.u32 %s1939_s30, 4  ;;  %s1833_s9 = int_to_ptr.vmem [resolvable:$false] %s1832_s9 }
  0x73   : > { %1341 = vmatpush1.bf16.msra.mxu0 %v1340_v8  ;;  %v1470_v17 = vpack.c.bf16 %v327_v15, %v323_v14  ;;  %v324_v19 = vld [vmem:[#allocation5 + $0x60] sm:$0xff]  ;;  %v326_v22 = vld [vmem:[#allocation5 + $0x70] sm:$0xff]  ;;  %v329_v23 = vld [vmem:[#allocation5 + $0x88] sm:$0xff]  ;;  %p1830_p2 = pnand %p1829_p1, %p2091_p6  ;;  %s1834_s13 = scalar_lea.vmem %s1833_s9, 1024 }
  0x74   : > { %1469 = vmatpush1.bf16.msra.mxu1 %v1468_v12  ;;  %v1344_v21 = vpack.c.bf16 %v324_v19, %v320_v18  ;;  %v333_v24 = vld [vmem:[#allocation5 + $0xa8] sm:$0xff]  ;;  %1343 = vmatprep.subr.bf16.mxu0 %v1342_v16  ;;  %v1472_v25 = vpack.c.bf16 %v326_v22, %v322_v20  ;;  %v331_v27 = vld [vmem:[#allocation5 + $0x98] sm:$0xff]  ;;  %v328_v29 = vld [vmem:[#allocation5 + $0x80] sm:$0xff]  ;;  %p1835_p8 = scmp.lt.s32.totalorder %s1124_s18, %s1833_s9  ;;  %p1836_p13 = scmp.lt.s32.totalorder %s1834_s13, %s1828_s7 }
  0x75   : > { %1471 = vmatprep.subr.bf16.mxu1 %v1470_v17  ;;  %v1346_v26 = vpack.c.bf16 %v333_v24, %v329_v23  ;;  %v335_v28 = vld [vmem:[#allocation5 + $0xb8] sm:$0xff]  ;;  %v332_v31 = vld [vmem:[#allocation5 + $0xa0] sm:$0xff]  ;;  %v330_v32 = vld [vmem:[#allocation5 + $0x90] sm:$0xff]  ;;  %p1831_p4 = pneg %p1830_p2 }
  0x76   : > { %v1474_v30 = vpack.c.bf16 %v335_v28, %v331_v27  ;;  %v334_v33 = vld [vmem:[#allocation5 + $0xb0] sm:$0xff]  ;;  %v1348_v34 = vpack.c.bf16 %v332_v31, %v328_v29  ;;  %v337_v35 = vld [vmem:[#allocation5 + $0xc8] sm:$0xff]  ;;  %v339_v37 = vld [vmem:[#allocation5 + $0xd8] sm:$0xff]  ;;  %p1837_p3 = por %p1836_p13, %p1835_p8 }
  0x77   : > { %1345 = vmatpush1.bf16.msra.mxu0 %v1344_v21  ;;  %v341_v36 = vld [vmem:[#allocation5 + $0xe8] sm:$0xff]  ;;  %v1476_v38 = vpack.c.bf16 %v334_v33, %v330_v32  ;;  %v343_v40 = vld [vmem:[#allocation5 + $0xf8] sm:$0xff]  ;;  %v336_v41 = vld [vmem:[#allocation5 + $0xc0] sm:$0xff] }
  0x78   : > { %1473 = vmatpush1.bf16.msra.mxu1 %v1472_v25  ;;  %1347 = vmatprep.subr.bf16.mxu0 %v1346_v26  ;;  %v1350_v39 = vpack.c.bf16 %v341_v36, %v337_v35  ;;  %v340_v42 = vld [vmem:[#allocation5 + $0xe0] sm:$0xff]  ;;  %v1478_v43 = vpack.c.bf16 %v343_v40, %v339_v37  ;;  %v338_v44 = vld [vmem:[#allocation5 + $0xd0] sm:$0xff]  ;;  %v345_v46 = vld [vmem:[#allocation5 + $0x108] sm:$0xff]  ;;  %p1838_p7 = pnand %p1837_p3, %p1831_p4 }
  0x79   : > { %1475 = vmatprep.subr.bf16.mxu1 %v1474_v30  ;;  %v342_v45 = vld [vmem:[#allocation5 + $0xf0] sm:$0xff]  ;;  %v349_v47 = vld [vmem:[#allocation5 + $0x128] sm:$0xff]  ;;  %v347_v48 = vld [vmem:[#allocation5 + $0x118] sm:$0xff]  ;;  %v1352_v50 = vpack.c.bf16 %v340_v42, %v336_v41 }
  0x7a   : > { %v351_v49 = vld [vmem:[#allocation5 + $0x138] sm:$0xff]  ;;  %v1480_v51 = vpack.c.bf16 %v342_v45, %v338_v44  ;;  %v1354_v52 = vpack.c.bf16 %v349_v47, %v345_v46  ;;  %v344_v53 = vld [vmem:[#allocation5 + $0x100] sm:$0xff]  ;;  %v346_v55 = vld [vmem:[#allocation5 + $0x110] sm:$0xff] }
  0x7b   : > { %1349 = vmatpush1.bf16.msra.mxu0 %v1348_v34  ;;  %v348_v54 = vld [vmem:[#allocation5 + $0x120] sm:$0xff]  ;;  %v1482_v56 = vpack.c.bf16 %v351_v49, %v347_v48  ;;  %v350_v57 = vld [vmem:[#allocation5 + $0x130] sm:$0xff]  ;;  %v353_v58 = vld [vmem:[#allocation5 + $0x148] sm:$0xff] }
  0x7c   : > { %1477 = vmatpush1.bf16.msra.mxu1 %v1476_v38  ;;  %1351 = vmatprep.subr.bf16.mxu0 %v1350_v39  ;;  %v357_v59 = vld [vmem:[#allocation5 + $0x168] sm:$0xff]  ;;  %v355_v60 = vld [vmem:[#allocation5 + $0x158] sm:$0xff]  ;;  %v1356_v62 = vpack.c.bf16 %v348_v54, %v344_v53  ;;  %v1484_v63 = vpack.c.bf16 %v350_v57, %v346_v55  ;;  %v352_v1 = vld [vmem:[#allocation5 + $0x140] sm:$0xff] }
  0x7d   : > { %1479 = vmatprep.subr.bf16.mxu1 %v1478_v43  ;;  %v359_v61 = vld [vmem:[#allocation5 + $0x178] sm:$0xff]  ;;  %v1358_v0 = vpack.c.bf16 %v357_v59, %v353_v58  ;;  %v356_v2 = vld [vmem:[#allocation5 + $0x160] sm:$0xff]  ;;  %v354_v3 = vld [vmem:[#allocation5 + $0x150] sm:$0xff] }
  0x7e   : > { %v1486_v4 = vpack.c.bf16 %v359_v61, %v355_v60  ;;  %v358_v5 = vld [vmem:[#allocation5 + $0x170] sm:$0xff]  ;;  %v361_v6 = vld [vmem:[#allocation5 + $0x188] sm:$0xff]  ;;  %v363_v8 = vld [vmem:[#allocation5 + $0x198] sm:$0xff]  ;;  %v1360_v10 = vpack.c.bf16 %v356_v2, %v352_v1 }
  0x7f   : > { %1353 = vmatpush1.bf16.msra.mxu0 %v1352_v50  ;;  %v365_v7 = vld [vmem:[#allocation5 + $0x1a8] sm:$0xff]  ;;  %v367_v9 = vld [vmem:[#allocation5 + $0x1b8] sm:$0xff]  ;;  %v1488_v11 = vpack.c.bf16 %v358_v5, %v354_v3  ;;  %v360_v13 = vld [vmem:[#allocation5 + $0x180] sm:$0xff] }
  0x80   : > { %1481 = vmatpush1.bf16.msra.mxu1 %v1480_v51  ;;  %1355 = vmatprep.subr.bf16.mxu0 %v1354_v52  ;;  %v1362_v12 = vpack.c.bf16 %v365_v7, %v361_v6  ;;  %v364_v14 = vld [vmem:[#allocation5 + $0x1a0] sm:$0xff]  ;;  %v362_v15 = vld [vmem:[#allocation5 + $0x190] sm:$0xff]  ;;  %v1490_v16 = vpack.c.bf16 %v367_v9, %v363_v8  ;;  %v369_v18 = vld [vmem:[#allocation5 + $0x1c8] sm:$0xff] }
  0x81   : > { %1483 = vmatprep.subr.bf16.mxu1 %v1482_v56  ;;  %v366_v17 = vld [vmem:[#allocation5 + $0x1b0] sm:$0xff]  ;;  %v373_v19 = vld [vmem:[#allocation5 + $0x1e8] sm:$0xff]  ;;  %v371_v20 = vld [vmem:[#allocation5 + $0x1d8] sm:$0xff]  ;;  %v1364_v22 = vpack.c.bf16 %v364_v14, %v360_v13 }
  0x82   : > { %v375_v21 = vld [vmem:[#allocation5 + $0x1f8] sm:$0xff]  ;;  %v1492_v23 = vpack.c.bf16 %v366_v17, %v362_v15  ;;  %v1366_v24 = vpack.c.bf16 %v373_v19, %v369_v18  ;;  %v368_v25 = vld [vmem:[#allocation5 + $0x1c0] sm:$0xff]  ;;  %v370_v27 = vld [vmem:[#allocation5 + $0x1d0] sm:$0xff] }
  0x83   : > { %1357 = vmatpush1.bf16.msra.mxu0 %v1356_v62  ;;  %v372_v26 = vld [vmem:[#allocation5 + $0x1e0] sm:$0xff]  ;;  %v1494_v28 = vpack.c.bf16 %v375_v21, %v371_v20  ;;  %v374_v29 = vld [vmem:[#allocation5 + $0x1f0] sm:$0xff]  ;;  %v377_v30 = vld [vmem:[#allocation5 + $0x208] sm:$0xff] }
  0x84   : > { %1485 = vmatpush1.bf16.msra.mxu1 %v1484_v63  ;;  %1359 = vmatprep.subr.bf16.mxu0 %v1358_v0  ;;  %v381_v31 = vld [vmem:[#allocation5 + $0x228] sm:$0xff]  ;;  %v379_v32 = vld [vmem:[#allocation5 + $0x218] sm:$0xff]  ;;  %v1368_v34 = vpack.c.bf16 %v372_v26, %v368_v25  ;;  %v1496_v35 = vpack.c.bf16 %v374_v29, %v370_v27  ;;  %v376_v37 = vld [vmem:[#allocation5 + $0x200] sm:$0xff] }
  0x85   : > { %1487 = vmatprep.subr.bf16.mxu1 %v1486_v4  ;;  %v383_v33 = vld [vmem:[#allocation5 + $0x238] sm:$0xff]  ;;  %v1370_v36 = vpack.c.bf16 %v381_v31, %v377_v30  ;;  %v380_v38 = vld [vmem:[#allocation5 + $0x220] sm:$0xff]  ;;  %v378_v39 = vld [vmem:[#allocation5 + $0x210] sm:$0xff] }
  0x86   : > { %v1498_v40 = vpack.c.bf16 %v383_v33, %v379_v32  ;;  %v382_v41 = vld [vmem:[#allocation5 + $0x230] sm:$0xff]  ;;  %v385_v42 = vld [vmem:[#allocation5 + $0x248] sm:$0xff]  ;;  %v387_v44 = vld [vmem:[#allocation5 + $0x258] sm:$0xff]  ;;  %v1372_v46 = vpack.c.bf16 %v380_v38, %v376_v37 }
  0x87   : > { %1361 = vmatpush1.bf16.msra.mxu0 %v1360_v10  ;;  %v389_v43 = vld [vmem:[#allocation5 + $0x268] sm:$0xff]  ;;  %v391_v45 = vld [vmem:[#allocation5 + $0x278] sm:$0xff]  ;;  %v1500_v47 = vpack.c.bf16 %v382_v41, %v378_v39  ;;  %v384_v49 = vld [vmem:[#allocation5 + $0x240] sm:$0xff] }
  0x88   : > { %1489 = vmatpush1.bf16.msra.mxu1 %v1488_v11  ;;  %1363 = vmatprep.subr.bf16.mxu0 %v1362_v12  ;;  %v1374_v48 = vpack.c.bf16 %v389_v43, %v385_v42  ;;  %v388_v50 = vld [vmem:[#allocation5 + $0x260] sm:$0xff]  ;;  %v386_v51 = vld [vmem:[#allocation5 + $0x250] sm:$0xff]  ;;  %v1502_v52 = vpack.c.bf16 %v391_v45, %v387_v44  ;;  %v393_v54 = vld [vmem:[#allocation5 + $0x288] sm:$0xff] }
  0x89   : > { %1491 = vmatprep.subr.bf16.mxu1 %v1490_v16  ;;  %v390_v53 = vld [vmem:[#allocation5 + $0x270] sm:$0xff]  ;;  %v397_v55 = vld [vmem:[#allocation5 + $0x2a8] sm:$0xff]  ;;  %v395_v56 = vld [vmem:[#allocation5 + $0x298] sm:$0xff]  ;;  %v1376_v58 = vpack.c.bf16 %v388_v50, %v384_v49 }
  0x8a   : > { %v399_v57 = vld [vmem:[#allocation5 + $0x2b8] sm:$0xff]  ;;  %v1504_v59 = vpack.c.bf16 %v390_v53, %v386_v51  ;;  %v1378_v60 = vpack.c.bf16 %v397_v55, %v393_v54  ;;  %v392_v61 = vld [vmem:[#allocation5 + $0x280] sm:$0xff]  ;;  %v394_v63 = vld [vmem:[#allocation5 + $0x290] sm:$0xff] }
  0x8b   : > { %1365 = vmatpush1.bf16.msra.mxu0 %v1364_v22  ;;  %v396_v62 = vld [vmem:[#allocation5 + $0x2a0] sm:$0xff]  ;;  %v1506_v0 = vpack.c.bf16 %v399_v57, %v395_v56  ;;  %v398_v1 = vld [vmem:[#allocation5 + $0x2b0] sm:$0xff]  ;;  %v401_v2 = vld [vmem:[#allocation5 + $0x2c8] sm:$0xff] }
  0x8c   : > { %1493 = vmatpush1.bf16.msra.mxu1 %v1492_v23  ;;  %1367 = vmatprep.subr.bf16.mxu0 %v1366_v24  ;;  %v405_v3 = vld [vmem:[#allocation5 + $0x2e8] sm:$0xff]  ;;  %v403_v4 = vld [vmem:[#allocation5 + $0x2d8] sm:$0xff]  ;;  %v1380_v6 = vpack.c.bf16 %v396_v62, %v392_v61  ;;  %v400_v7 = vld [vmem:[#allocation5 + $0x2c0] sm:$0xff]  ;;  %v1508_v8 = vpack.c.bf16 %v398_v1, %v394_v63 }
  0x8d   : > { %1495 = vmatprep.subr.bf16.mxu1 %v1494_v28  ;;  %v407_v5 = vld [vmem:[#allocation5 + $0x2f8] sm:$0xff]  ;;  %v1382_v9 = vpack.c.bf16 %v405_v3, %v401_v2  ;;  %v404_v10 = vld [vmem:[#allocation5 + $0x2e0] sm:$0xff]  ;;  %v402_v11 = vld [vmem:[#allocation5 + $0x2d0] sm:$0xff] }
  0x8e   : > { %v406_v12 = vld [vmem:[#allocation5 + $0x2f0] sm:$0xff]  ;;  %v1510_v13 = vpack.c.bf16 %v407_v5, %v403_v4  ;;  %v409_v14 = vld [vmem:[#allocation5 + $0x308] sm:$0xff]  ;;  %v411_v17 = vld [vmem:[#allocation5 + $0x318] sm:$0xff]  ;;  %v1384_v19 = vpack.c.bf16 %v404_v10, %v400_v7 }
  0x8f   : > { %1369 = vmatpush1.bf16.msra.mxu0 %v1368_v34  ;;  %v413_v15 = vld [vmem:[#allocation5 + $0x328] sm:$0xff]  ;;  %v415_v18 = vld [vmem:[#allocation5 + $0x338] sm:$0xff]  ;;  %v1512_v20 = vpack.c.bf16 %v406_v12, %v402_v11  ;;  %v408_v22 = vld [vmem:[#allocation5 + $0x300] sm:$0xff] }
  0x90   : > { %1497 = vmatpush1.bf16.msra.mxu1 %v1496_v35  ;;  %1371 = vmatprep.subr.bf16.mxu0 %v1370_v36  ;;  %v309_v16 = vld [vmem:[%s2143_s10 + $0x8] sm:$0xff]  ;;  %v1386_v21 = vpack.c.bf16 %v413_v15, %v409_v14  ;;  %v412_v23 = vld [vmem:[#allocation5 + $0x320] sm:$0xff]  ;;  %v410_v24 = vld [vmem:[#allocation5 + $0x310] sm:$0xff]  ;;  %v1514_v25 = vpack.c.bf16 %v415_v18, %v411_v17 }
  0x91   : > { %1499 = vmatprep.subr.bf16.mxu1 %v1498_v40  ;;  %654 = vmatprep.mubr.f32.mxu0 %v309_v16  ;;  %v414_v26 = vld [vmem:[#allocation5 + $0x330] sm:$0xff]  ;;  %v417_v27 = vld [vmem:[#allocation5 + $0x348] sm:$0xff]  ;;  %v419_v29 = vld [vmem:[#allocation5 + $0x358] sm:$0xff]  ;;  %v1388_v31 = vpack.c.bf16 %v412_v23, %v408_v22 }
  0x92   : > { %796 = vmatprep.mubr.f32.mxu1 %v309_v16  ;;  %v421_v28 = vld [vmem:[#allocation5 + $0x368] sm:$0xff]  ;;  %v423_v30 = vld [vmem:[#allocation5 + $0x378] sm:$0xff]  ;;  %v1516_v32 = vpack.c.bf16 %v414_v26, %v410_v24  ;;  %v416_v34 = vld [vmem:[#allocation5 + $0x340] sm:$0xff] }
  0x93   : > { %1373 = vmatpush1.bf16.msra.mxu0 %v1372_v46  ;;  %v1390_v33 = vpack.c.bf16 %v421_v28, %v417_v27  ;;  %v420_v35 = vld [vmem:[#allocation5 + $0x360] sm:$0xff]  ;;  %v418_v36 = vld [vmem:[#allocation5 + $0x350] sm:$0xff]  ;;  %v1518_v37 = vpack.c.bf16 %v423_v30, %v419_v29  ;;  %v425_v39 = vld [vmem:[#allocation5 + $0x388] sm:$0xff] }
  0x94   : > { %1501 = vmatpush1.bf16.msra.mxu1 %v1500_v47  ;;  %1375 = vmatprep.subr.bf16.mxu0 %v1374_v48  ;;  %v422_v38 = vld [vmem:[#allocation5 + $0x370] sm:$0xff]  ;;  %v429_v40 = vld [vmem:[#allocation5 + $0x3a8] sm:$0xff]  ;;  %v427_v41 = vld [vmem:[#allocation5 + $0x398] sm:$0xff]  ;;  %v1392_v43 = vpack.c.bf16 %v420_v35, %v416_v34 }
  0x95   : > { %1503 = vmatprep.subr.bf16.mxu1 %v1502_v52  ;;  %v431_v42 = vld [vmem:[#allocation5 + $0x3b8] sm:$0xff]  ;;  %v1520_v44 = vpack.c.bf16 %v422_v38, %v418_v36  ;;  %v1394_v45 = vpack.c.bf16 %v429_v40, %v425_v39  ;;  %v424_v46 = vld [vmem:[#allocation5 + $0x380] sm:$0xff]  ;;  %v426_v48 = vld [vmem:[#allocation5 + $0x390] sm:$0xff] }
  0x96   : > { %v428_v47 = vld [vmem:[#allocation5 + $0x3a0] sm:$0xff]  ;;  %v1522_v49 = vpack.c.bf16 %v431_v42, %v427_v41  ;;  %v430_v50 = vld [vmem:[#allocation5 + $0x3b0] sm:$0xff]  ;;  %v433_v51 = vld [vmem:[#allocation5 + $0x3c8] sm:$0xff] }
  0x97   : > { %1377 = vmatpush1.bf16.msra.mxu0 %v1376_v58  ;;  %v437_v52 = vld [vmem:[#allocation5 + $0x3e8] sm:$0xff]  ;;  %v435_v53 = vld [vmem:[#allocation5 + $0x3d8] sm:$0xff]  ;;  %v1396_v55 = vpack.c.bf16 %v428_v47, %v424_v46  ;;  %v1524_v56 = vpack.c.bf16 %v430_v50, %v426_v48  ;;  %v432_v58 = vld [vmem:[#allocation5 + $0x3c0] sm:$0xff] }
  0x98   : > { %1505 = vmatpush1.bf16.msra.mxu1 %v1504_v59  ;;  %1379 = vmatprep.subr.bf16.mxu0 %v1378_v60  ;;  %v439_v54 = vld [vmem:[#allocation5 + $0x3f8] sm:$0xff]  ;;  %v1398_v57 = vpack.c.bf16 %v437_v52, %v433_v51  ;;  %v436_v59 = vld [vmem:[#allocation5 + $0x3e0] sm:$0xff]  ;;  %v434_v60 = vld [vmem:[#allocation5 + $0x3d0] sm:$0xff] }
  0x99   : > { %1507 = vmatprep.subr.bf16.mxu1 %v1506_v0  ;;  %v1526_v61 = vpack.c.bf16 %v439_v54, %v435_v53  ;;  %v438_v62 = vld [vmem:[#allocation5 + $0x3f0] sm:$0xff]  ;;  %v441_v63 = vld [vmem:[#allocation5 + $0x408] sm:$0xff]  ;;  %v443_v1 = vld [vmem:[#allocation5 + $0x418] sm:$0xff]  ;;  %v1400_v3 = vpack.c.bf16 %v436_v59, %v432_v58 }
  0x9a   : > { %v445_v0 = vld [vmem:[#allocation5 + $0x428] sm:$0xff]  ;;  %v447_v2 = vld [vmem:[#allocation5 + $0x438] sm:$0xff]  ;;  %v1528_v4 = vpack.c.bf16 %v438_v62, %v434_v60  ;;  %v444_v7 = vld [vmem:[#allocation5 + $0x420] sm:$0xff] }
  0x9b   : > { %1381 = vmatpush1.bf16.msra.mxu0 %v1380_v6  ;;  %v1402_v5 = vpack.c.bf16 %v445_v0, %v441_v63  ;;  %v440_v6 = vld [vmem:[#allocation5 + $0x400] sm:$0xff]  ;;  %v446_v10 = vld [vmem:[#allocation5 + $0x430] sm:$0xff]  ;;  %v449_v11 = vld [vmem:[#allocation5 + $0x448] sm:$0xff] }
  0x9c   : > { %1509 = vmatpush1.bf16.msra.mxu1 %v1508_v8  ;;  %1383 = vmatprep.subr.bf16.mxu0 %v1382_v9  ;;  %v442_v8 = vld [vmem:[#allocation5 + $0x410] sm:$0xff]  ;;  %v1530_v9 = vpack.c.bf16 %v447_v2, %v443_v1  ;;  %v453_v12 = vld [vmem:[#allocation5 + $0x468] sm:$0xff]  ;;  %v455_v14 = vld [vmem:[#allocation5 + $0x478] sm:$0xff]  ;;  %v1404_v16 = vpack.c.bf16 %v444_v7, %v440_v6 }
  0x9d   : > { %1511 = vmatprep.subr.bf16.mxu1 %v1510_v13  ;;  %v451_v13 = vld [vmem:[#allocation5 + $0x458] sm:$0xff]  ;;  %v308_v15 = vld [vmem:[%s2143_s10] sm:$0xff]  ;;  %v1532_v17 = vpack.c.bf16 %v446_v10, %v442_v8  ;;  %v1406_v18 = vpack.c.bf16 %v453_v12, %v449_v11  ;;  %v454_v23 = vld [vmem:[#allocation5 + $0x470] sm:$0xff] }
  0x9e   : > { %v1534_v22 = vpack.c.bf16 %v455_v14, %v451_v13  ;;  %v457_v24 = vld [vmem:[#allocation5 + $0x488] sm:$0xff]  ;;  %v459_v26 = vld [vmem:[#allocation5 + $0x498] sm:$0xff]  ;;  %v462_v35 = vld [vmem:[#allocation5 + $0x4b0] sm:$0xff] }
  0x9f   : > { %1385 = vmatpush1.bf16.msra.mxu0 %v1384_v19  ;;  %v448_v19 = vld [vmem:[#allocation5 + $0x440] sm:$0xff]  ;;  %v463_v27 = vld [vmem:[#allocation5 + $0x4b8] sm:$0xff]  ;;  %v465_v36 = vld [vmem:[#allocation5 + $0x4c8] sm:$0xff] }
  0xa0   : > { %1513 = vmatpush1.bf16.msra.mxu1 %v1512_v20  ;;  %1387 = vmatprep.subr.bf16.mxu0 %v1386_v21  ;;  %v452_v20 = vld [vmem:[#allocation5 + $0x460] sm:$0xff]  ;;  %v450_v21 = vld [vmem:[#allocation5 + $0x450] sm:$0xff]  ;;  %v1538_v34 = vpack.c.bf16 %v463_v27, %v459_v26  ;;  %v467_v38 = vld [vmem:[#allocation5 + $0x4d8] sm:$0xff] }
  0xa1   : > { %1515 = vmatprep.subr.bf16.mxu1 %v1514_v25  ;;  %v461_v25 = vld [vmem:[#allocation5 + $0x4a8] sm:$0xff]  ;;  %v1408_v28 = vpack.c.bf16 %v452_v20, %v448_v19  ;;  %v1536_v29 = vpack.c.bf16 %v454_v23, %v450_v21  ;;  %v471_v39 = vld [vmem:[#allocation5 + $0x4f8] sm:$0xff]  ;;  %v470_v47 = vld [vmem:[#allocation5 + $0x4f0] sm:$0xff] }
  0xa2   : > { %v1410_v30 = vpack.c.bf16 %v461_v25, %v457_v24  ;;  %v1542_v46 = vpack.c.bf16 %v471_v39, %v467_v38  ;;  %v473_v48 = vld [vmem:[#allocation5 + $0x508] sm:$0xff]  ;;  %v475_v50 = vld [vmem:[#allocation5 + $0x518] sm:$0xff]  ;;  %v478_v59 = vld [vmem:[#allocation5 + $0x530] sm:$0xff] }
  0xa3   : > { %1389 = vmatpush1.bf16.msra.mxu0 %v1388_v31  ;;  %v456_v31 = vld [vmem:[#allocation5 + $0x480] sm:$0xff]  ;;  %v479_v51 = vld [vmem:[#allocation5 + $0x538] sm:$0xff]  ;;  %v481_v60 = vld [vmem:[#allocation5 + $0x548] sm:$0xff] }
  0xa4   : > { %1517 = vmatpush1.bf16.msra.mxu1 %v1516_v32  ;;  %1391 = vmatprep.subr.bf16.mxu0 %v1390_v33  ;;  %v460_v32 = vld [vmem:[#allocation5 + $0x4a0] sm:$0xff]  ;;  %v458_v33 = vld [vmem:[#allocation5 + $0x490] sm:$0xff]  ;;  %v1546_v58 = vpack.c.bf16 %v479_v51, %v475_v50  ;;  %v483_v62 = vld [vmem:[#allocation5 + $0x558] sm:$0xff] }
  0xa5   : > { %1519 = vmatprep.subr.bf16.mxu1 %v1518_v37  ;;  %v469_v37 = vld [vmem:[#allocation5 + $0x4e8] sm:$0xff]  ;;  %v1412_v40 = vpack.c.bf16 %v460_v32, %v456_v31  ;;  %v1540_v41 = vpack.c.bf16 %v462_v35, %v458_v33  ;;  %v487_v63 = vld [vmem:[#allocation5 + $0x578] sm:$0xff]  ;;  %v486_v7 = vld [vmem:[#allocation5 + $0x570] sm:$0xff] }
  0xa6   : > { %v1414_v42 = vpack.c.bf16 %v469_v37, %v465_v36  ;;  %v1550_v6 = vpack.c.bf16 %v487_v63, %v483_v62  ;;  %v489_v8 = vld [vmem:[#allocation5 + $0x588] sm:$0xff]  ;;  %v491_v10 = vld [vmem:[#allocation5 + $0x598] sm:$0xff]  ;;  %v488_v13 = vld [vmem:[#allocation5 + $0x580] sm:$0xff] }
  0xa7   : > { %1393 = vmatpush1.bf16.msra.mxu0 %v1392_v43  ;;  %v464_v43 = vld [vmem:[#allocation5 + $0x4c0] sm:$0xff]  ;;  %v495_v11 = vld [vmem:[#allocation5 + $0x5b8] sm:$0xff]  ;;  %v497_v20 = vld [vmem:[#allocation5 + $0x5c8] sm:$0xff] }
  0xa8   : > { %1521 = vmatpush1.bf16.msra.mxu1 %v1520_v44  ;;  %1395 = vmatprep.subr.bf16.mxu0 %v1394_v45  ;;  %v468_v44 = vld [vmem:[#allocation5 + $0x4e0] sm:$0xff]  ;;  %v466_v45 = vld [vmem:[#allocation5 + $0x4d0] sm:$0xff]  ;;  %v1554_v19 = vpack.c.bf16 %v495_v11, %v491_v10  ;;  %v501_v21 = vld [vmem:[#allocation5 + $0x5e8] sm:$0xff] }
  0xa9   : > { %1523 = vmatprep.subr.bf16.mxu1 %v1522_v49  ;;  %v477_v49 = vld [vmem:[#allocation5 + $0x528] sm:$0xff]  ;;  %v1416_v52 = vpack.c.bf16 %v468_v44, %v464_v43  ;;  %v1544_v53 = vpack.c.bf16 %v470_v47, %v466_v45  ;;  %v499_v23 = vld [vmem:[#allocation5 + $0x5d8] sm:$0xff]  ;;  %v1430_v27 = vpack.c.bf16 %v501_v21, %v497_v20  ;;  %v502_v32 = vld [vmem:[#allocation5 + $0x5f0] sm:$0xff] }
  0xaa   : > { %v1418_v54 = vpack.c.bf16 %v477_v49, %v473_v48  ;;  %v503_v24 = vld [vmem:[#allocation5 + $0x5f8] sm:$0xff]  ;;  %v505_v33 = vld [vmem:[#allocation5 + $0x608] sm:$0xff]  ;;  %v510_v44 = vld [vmem:[#allocation5 + $0x630] sm:$0xff] }
  0xab   : > { %1397 = vmatpush1.bf16.msra.mxu0 %v1396_v55  ;;  %v472_v55 = vld [vmem:[#allocation5 + $0x500] sm:$0xff]  ;;  %v1558_v31 = vpack.c.bf16 %v503_v24, %v499_v23  ;;  %v507_v35 = vld [vmem:[#allocation5 + $0x618] sm:$0xff]  ;;  %v513_v45 = vld [vmem:[#allocation5 + $0x648] sm:$0xff] }
  0xac   : > { %1525 = vmatpush1.bf16.msra.mxu1 %v1524_v56  ;;  %1399 = vmatprep.subr.bf16.mxu0 %v1398_v57  ;;  %v476_v56 = vld [vmem:[#allocation5 + $0x520] sm:$0xff]  ;;  %v474_v57 = vld [vmem:[#allocation5 + $0x510] sm:$0xff]  ;;  %v511_v36 = vld [vmem:[#allocation5 + $0x638] sm:$0xff] }
  0xad   : > { %1527 = vmatprep.subr.bf16.mxu1 %v1526_v61  ;;  %v485_v61 = vld [vmem:[#allocation5 + $0x568] sm:$0xff]  ;;  %v1420_v0 = vpack.c.bf16 %v476_v56, %v472_v55  ;;  %v1548_v1 = vpack.c.bf16 %v478_v59, %v474_v57  ;;  %v1562_v43 = vpack.c.bf16 %v511_v36, %v507_v35  ;;  %v515_v47 = vld [vmem:[#allocation5 + $0x658] sm:$0xff]  ;;  %v518_v56 = vld [vmem:[#allocation5 + $0x670] sm:$0xff] }
  0xae   : > { %v1422_v2 = vpack.c.bf16 %v485_v61, %v481_v60  ;;  %v519_v48 = vld [vmem:[#allocation5 + $0x678] sm:$0xff]  ;;  %v521_v57 = vld [vmem:[#allocation5 + $0x688] sm:$0xff]  ;;  %v536_v24 = vld [vmem:[#allocation5 + $0x700] sm:$0xff] }
  0xaf   : > { %1401 = vmatpush1.bf16.msra.mxu0 %v1400_v3  ;;  %v480_v3 = vld [vmem:[#allocation5 + $0x540] sm:$0xff]  ;;  %v1566_v55 = vpack.c.bf16 %v519_v48, %v515_v47  ;;  %v523_v59 = vld [vmem:[#allocation5 + $0x698] sm:$0xff] }
  0xb0   : > { %1529 = vmatpush1.bf16.msra.mxu1 %v1528_v4  ;;  %1403 = vmatprep.subr.bf16.mxu0 %v1402_v5  ;;  %v484_v4 = vld [vmem:[#allocation5 + $0x560] sm:$0xff]  ;;  %v482_v5 = vld [vmem:[#allocation5 + $0x550] sm:$0xff]  ;;  %v527_v60 = vld [vmem:[#allocation5 + $0x6b8] sm:$0xff] }
  0xb1   : > { %1531 = vmatprep.subr.bf16.mxu1 %v1530_v9  ;;  %v493_v9 = vld [vmem:[#allocation5 + $0x5a8] sm:$0xff]  ;;  %v1424_v12 = vpack.c.bf16 %v484_v4, %v480_v3  ;;  %v1552_v14 = vpack.c.bf16 %v486_v7, %v482_v5  ;;  %v1570_v3 = vpack.c.bf16 %v527_v60, %v523_v59  ;;  %v526_v4 = vld [vmem:[#allocation5 + $0x6b0] sm:$0xff]  ;;  %v531_v7 = vld [vmem:[#allocation5 + $0x6d8] sm:$0xff] }
  0xb2   : > { %655 = vmatmul.mubr.f32.vlgmr.msra.gmra.mrb[0].mxu0 %v308_v15  ;;  %v529_v5 = vld [vmem:[#allocation5 + $0x6c8] sm:$0xff]  ;;  %v543_v20 = vld [vmem:[#allocation5 + $0x738] sm:$0xff]  ;;  %v544_v36 = vld [vmem:[#allocation5 + $0x740] sm:$0xff] }
  0xb3   : > { %1405 = vmatpush1.bf16.msra.mxu0 %v1404_v16  ;;  %797 = vmatmul.mubr.f32.vlgmr.msra.gmra.mrb[0].mxu1 %v308_v15  ;;  %v1426_v15 = vpack.c.bf16 %v493_v9, %v489_v8  ;;  %v492_v16 = vld [vmem:[#allocation5 + $0x5a0] sm:$0xff]  ;;  %v535_v8 = vld [vmem:[#allocation5 + $0x6f8] sm:$0xff] }
  0xb4   : > { %1533 = vmatpush1.bf16.msra.mxu1 %v1532_v17  ;;  %1407 = vmatprep.subr.bf16.mxu0 %v1406_v18  ;;  %v490_v17 = vld [vmem:[#allocation5 + $0x590] sm:$0xff]  ;;  %v1428_v25 = vpack.c.bf16 %v492_v16, %v488_v13  ;;  %v532_v13 = vld [vmem:[#allocation5 + $0x6e0] sm:$0xff] }
  0xb5   : > { %1535 = vmatprep.subr.bf16.mxu1 %v1534_v22  ;;  %v494_v18 = vld [vmem:[#allocation5 + $0x5b0] sm:$0xff]  ;;  %v311_v22 = vld [vmem:[%s2143_s10 + $0x18] sm:$0xff]  ;;  %v552_v48 = vld [vmem:[#allocation5 + $0x780] sm:$0xff] }
  0xb6   : > { %725 = vmatprep.mubr.f32.mxu0 %v311_v22  ;;  %867 = vmatprep.mubr.f32.mxu1 %v311_v22  ;;  %v1556_v26 = vpack.c.bf16 %v494_v18, %v490_v17  ;;  %v534_v16 = vld [vmem:[#allocation5 + $0x6f0] sm:$0xff]  ;;  %v537_v17 = vld [vmem:[#allocation5 + $0x708] sm:$0xff]  ;;  %v560_v60 = vld [vmem:[#allocation5 + $0x7c0] sm:$0xff] }
  0xb7   : > { %1409 = vmatpush1.bf16.msra.mxu0 %v1408_v28  ;;  %v496_v28 = vld [vmem:[#allocation5 + $0x5c0] sm:$0xff]  ;;  %v541_v18 = vld [vmem:[#allocation5 + $0x728] sm:$0xff] }
  0xb8   : > { %1537 = vmatpush1.bf16.msra.mxu1 %v1536_v29  ;;  %1411 = vmatprep.subr.bf16.mxu0 %v1410_v30  ;;  %v500_v29 = vld [vmem:[#allocation5 + $0x5e0] sm:$0xff]  ;;  %v498_v30 = vld [vmem:[#allocation5 + $0x5d0] sm:$0xff]  ;;  %v1450_v23 = vpack.c.bf16 %v541_v18, %v537_v17 }
  0xb9   : > { %1539 = vmatprep.subr.bf16.mxu1 %v1538_v34  ;;  %v509_v34 = vld [vmem:[#allocation5 + $0x628] sm:$0xff]  ;;  %v1432_v37 = vpack.c.bf16 %v500_v29, %v496_v28  ;;  %v1560_v38 = vpack.c.bf16 %v502_v32, %v498_v30  ;;  %v542_v28 = vld [vmem:[#allocation5 + $0x730] sm:$0xff]  ;;  %v551_v32 = vld [vmem:[#allocation5 + $0x778] sm:$0xff] }
  0xba   : > { %v1434_v39 = vpack.c.bf16 %v509_v34, %v505_v33  ;;  %v545_v29 = vld [vmem:[#allocation5 + $0x748] sm:$0xff]  ;;  %v310_v17 = vld [vmem:[%s2143_s10 + $0x10] sm:$0xff] }
  0xbb   : > { %1413 = vmatpush1.bf16.msra.mxu0 %v1412_v40  ;;  %v504_v40 = vld [vmem:[#allocation5 + $0x600] sm:$0xff]  ;;  %v549_v30 = vld [vmem:[#allocation5 + $0x768] sm:$0xff] }
  0xbc   : > { %1541 = vmatpush1.bf16.msra.mxu1 %v1540_v41  ;;  %1415 = vmatprep.subr.bf16.mxu0 %v1414_v42  ;;  %v508_v41 = vld [vmem:[#allocation5 + $0x620] sm:$0xff]  ;;  %v506_v42 = vld [vmem:[#allocation5 + $0x610] sm:$0xff]  ;;  %v1454_v35 = vpack.c.bf16 %v549_v30, %v545_v29  ;;  %v931_v29 = vld [vmem:[#allocation7 + $0x1a8] sm:$0xff] }
  0xbd   : > { %1543 = vmatprep.subr.bf16.mxu1 %v1542_v46  ;;  %v517_v46 = vld [vmem:[#allocation5 + $0x668] sm:$0xff]  ;;  %v1436_v49 = vpack.c.bf16 %v508_v41, %v504_v40  ;;  %v1564_v50 = vpack.c.bf16 %v510_v44, %v506_v42  ;;  %v550_v40 = vld [vmem:[#allocation5 + $0x770] sm:$0xff]  ;;  %v559_v44 = vld [vmem:[#allocation5 + $0x7b8] sm:$0xff] }
  0xbe   : > { %v1438_v51 = vpack.c.bf16 %v517_v46, %v513_v45  ;;  %v553_v41 = vld [vmem:[#allocation5 + $0x788] sm:$0xff] }
  0xbf   : > { %1417 = vmatpush1.bf16.msra.mxu0 %v1416_v52  ;;  %v512_v52 = vld [vmem:[#allocation5 + $0x640] sm:$0xff]  ;;  %v557_v42 = vld [vmem:[#allocation5 + $0x7a8] sm:$0xff] }
  0xc0   : > { %1545 = vmatpush1.bf16.msra.mxu1 %v1544_v53  ;;  %1419 = vmatprep.subr.bf16.mxu0 %v1418_v54  ;;  %v516_v53 = vld [vmem:[#allocation5 + $0x660] sm:$0xff]  ;;  %v514_v54 = vld [vmem:[#allocation5 + $0x650] sm:$0xff]  ;;  %v1458_v47 = vpack.c.bf16 %v557_v42, %v553_v41  ;;  %v933_v41 = vld [vmem:[#allocation7 + $0x1b8] sm:$0xff] }
  0xc1   : > { %1547 = vmatprep.subr.bf16.mxu1 %v1546_v58  ;;  %v525_v58 = vld [vmem:[#allocation5 + $0x6a8] sm:$0xff]  ;;  %v1440_v61 = vpack.c.bf16 %v516_v53, %v512_v52  ;;  %v1568_v62 = vpack.c.bf16 %v518_v56, %v514_v54  ;;  %v558_v52 = vld [vmem:[#allocation5 + $0x7b0] sm:$0xff]  ;;  %v567_v56 = vld [vmem:[#allocation5 + $0x7f8] sm:$0xff] }
  0xc2   : > { %v1442_v63 = vpack.c.bf16 %v525_v58, %v521_v57  ;;  %v561_v53 = vld [vmem:[#allocation5 + $0x7c8] sm:$0xff] }
  0xc3   : > { %1421 = vmatpush1.bf16.msra.mxu0 %v1420_v0  ;;  %v520_v0 = vld [vmem:[#allocation5 + $0x680] sm:$0xff]  ;;  %v565_v54 = vld [vmem:[#allocation5 + $0x7e8] sm:$0xff] }
  0xc4   : > { %1549 = vmatpush1.bf16.msra.mxu1 %v1548_v1  ;;  %1423 = vmatprep.subr.bf16.mxu0 %v1422_v2  ;;  %v524_v1 = vld [vmem:[#allocation5 + $0x6a0] sm:$0xff]  ;;  %v522_v2 = vld [vmem:[#allocation5 + $0x690] sm:$0xff]  ;;  %v1462_v59 = vpack.c.bf16 %v565_v54, %v561_v53  ;;  %v935_v53 = vld [vmem:[#allocation7 + $0x1c8] sm:$0xff] }
  0xc5   : > { %1551 = vmatprep.subr.bf16.mxu1 %v1550_v6  ;;  %v533_v6 = vld [vmem:[#allocation5 + $0x6e8] sm:$0xff]  ;;  %v1444_v9 = vpack.c.bf16 %v524_v1, %v520_v0  ;;  %v1572_v10 = vpack.c.bf16 %v526_v4, %v522_v2  ;;  %v566_v0 = vld [vmem:[#allocation5 + $0x7f0] sm:$0xff]  ;;  %v894_v1 = vld [vmem:[#allocation7 + $0x80] sm:$0xff] }
  0xc6   : > { %v1446_v11 = vpack.c.bf16 %v533_v6, %v529_v5  ;;  %v895_v2 = vld [vmem:[#allocation7 + $0x88] sm:$0xff] }
  0xc7   : > { %1425 = vmatpush1.bf16.msra.mxu0 %v1424_v12  ;;  %v528_v12 = vld [vmem:[#allocation5 + $0x6c0] sm:$0xff]  ;;  %v927_v4 = vld [vmem:[#allocation7 + $0x188] sm:$0xff] }
  0xc8   : > { %1553 = vmatpush1.bf16.msra.mxu1 %v1552_v14  ;;  %1427 = vmatprep.subr.bf16.mxu0 %v1426_v15  ;;  %v530_v14 = vld [vmem:[#allocation5 + $0x6d0] sm:$0xff]  ;;  %v1574_v15 = vpack.c.bf16 %v535_v8, %v531_v7  ;;  %v1448_v21 = vpack.c.bf16 %v532_v13, %v528_v12  ;;  %v1594_v7 = vpack.c.bf16 %v895_v2, %v894_v1  ;;  %v878_v8 = vld [vmem:[#allocation7] sm:$0xff]  ;;  %v911_v12 = vld [vmem:[#allocation7 + $0x108] sm:$0xff] }
  0xc9   : > { %1555 = vmatprep.subr.bf16.mxu1 %v1554_v19  ;;  %v539_v19 = vld [vmem:[#allocation5 + $0x718] sm:$0xff]  ;;  %v1576_v22 = vpack.c.bf16 %v534_v16, %v530_v14  ;;  %v896_v13 = vld [vmem:[#allocation7 + $0x90] sm:$0xff] }
  0xca   : > { %v897_v14 = vld [vmem:[#allocation7 + $0x98] sm:$0xff] }
  0xcb   : > { %1429 = vmatpush1.bf16.msra.mxu0 %v1428_v25  ;;  %v540_v25 = vld [vmem:[#allocation5 + $0x720] sm:$0xff]  ;;  %v929_v16 = vld [vmem:[#allocation7 + $0x198] sm:$0xff] }
  0xcc   : > { %1557 = vmatpush1.bf16.msra.mxu1 %v1556_v26  ;;  %1431 = vmatprep.subr.bf16.mxu0 %v1430_v27  ;;  %v538_v26 = vld [vmem:[#allocation5 + $0x710] sm:$0xff]  ;;  %v1578_v27 = vpack.c.bf16 %v543_v20, %v539_v19  ;;  %v1452_v33 = vpack.c.bf16 %v540_v25, %v536_v24  ;;  %v1598_v20 = vpack.c.bf16 %v897_v14, %v896_v13  ;;  %v913_v25 = vld [vmem:[#allocation7 + $0x118] sm:$0xff]  ;;  %v939_v13 = vld [vmem:[#allocation7 + $0x1e8] sm:$0xff] }
  0xcd   : > { %1559 = vmatprep.subr.bf16.mxu1 %v1558_v31  ;;  %v547_v31 = vld [vmem:[#allocation5 + $0x758] sm:$0xff]  ;;  %v1580_v34 = vpack.c.bf16 %v542_v28, %v538_v26  ;;  %v898_v26 = vld [vmem:[#allocation7 + $0xa0] sm:$0xff] }
  0xce   : > { %v930_v28 = vld [vmem:[#allocation7 + $0x1a0] sm:$0xff]  ;;  %v937_v1 = vld [vmem:[#allocation7 + $0x1d8] sm:$0xff] }
  0xcf   : > { %1433 = vmatpush1.bf16.msra.mxu0 %v1432_v37  ;;  %v548_v37 = vld [vmem:[#allocation5 + $0x760] sm:$0xff] }
  0xd0   : > { %1561 = vmatpush1.bf16.msra.mxu1 %v1560_v38  ;;  %1435 = vmatprep.subr.bf16.mxu0 %v1434_v39  ;;  %v546_v38 = vld [vmem:[#allocation5 + $0x750] sm:$0xff]  ;;  %v1582_v39 = vpack.c.bf16 %v551_v32, %v547_v31  ;;  %v1456_v45 = vpack.c.bf16 %v548_v37, %v544_v36  ;;  %v1634_v36 = vpack.c.bf16 %v931_v29, %v930_v28  ;;  %v915_v37 = vld [vmem:[#allocation7 + $0x128] sm:$0xff]  ;;  %v941_v28 = vld [vmem:[#allocation7 + $0x1f8] sm:$0xff] }
  0xd1   : > { %1563 = vmatprep.subr.bf16.mxu1 %v1562_v43  ;;  %v555_v43 = vld [vmem:[#allocation5 + $0x798] sm:$0xff]  ;;  %v1584_v46 = vpack.c.bf16 %v550_v40, %v546_v38  ;;  %v900_v38 = vld [vmem:[#allocation7 + $0xb0] sm:$0xff] }
  0xd2   : > { %v932_v40 = vld [vmem:[#allocation7 + $0x1b0] sm:$0xff] }
  0xd3   : > { %1437 = vmatpush1.bf16.msra.mxu0 %v1436_v49  ;;  %v556_v49 = vld [vmem:[#allocation5 + $0x7a0] sm:$0xff]  ;;  %v892_v29 = vld [vmem:[#allocation7 + $0x70] sm:$0xff] }
  0xd4   : > { %1565 = vmatpush1.bf16.msra.mxu1 %v1564_v50  ;;  %1439 = vmatprep.subr.bf16.mxu0 %v1438_v51  ;;  %v554_v50 = vld [vmem:[#allocation5 + $0x790] sm:$0xff]  ;;  %v1586_v51 = vpack.c.bf16 %v559_v44, %v555_v43  ;;  %v1460_v57 = vpack.c.bf16 %v556_v49, %v552_v48  ;;  %v1638_v48 = vpack.c.bf16 %v933_v41, %v932_v40  ;;  %v917_v49 = vld [vmem:[#allocation7 + $0x138] sm:$0xff] }
  0xd5   : > { %1567 = vmatprep.subr.bf16.mxu1 %v1566_v55  ;;  %v563_v55 = vld [vmem:[#allocation5 + $0x7d8] sm:$0xff]  ;;  %v1588_v58 = vpack.c.bf16 %v558_v52, %v554_v50  ;;  %v902_v50 = vld [vmem:[#allocation7 + $0xc0] sm:$0xff] }
  0xd6   : > { %v934_v52 = vld [vmem:[#allocation7 + $0x1c0] sm:$0xff] }
  0xd7   : > { %1441 = vmatpush1.bf16.msra.mxu0 %v1440_v61  ;;  %v564_v61 = vld [vmem:[#allocation5 + $0x7e0] sm:$0xff] }
  0xd8   : > { %1569 = vmatpush1.bf16.msra.mxu1 %v1568_v62  ;;  %1443 = vmatprep.subr.bf16.mxu0 %v1442_v63  ;;  %v562_v62 = vld [vmem:[#allocation5 + $0x7d0] sm:$0xff]  ;;  %v1590_v63 = vpack.c.bf16 %v567_v56, %v563_v55  ;;  %v1464_v5 = vpack.c.bf16 %v564_v61, %v560_v60  ;;  %v1642_v60 = vpack.c.bf16 %v935_v53, %v934_v52  ;;  %v919_v61 = vld [vmem:[#allocation7 + $0x148] sm:$0xff] }
  0xd9   : > { %1571 = vmatprep.subr.bf16.mxu1 %v1570_v3  ;;  %v926_v3 = vld [vmem:[#allocation7 + $0x180] sm:$0xff]  ;;  %v1592_v6 = vpack.c.bf16 %v566_v0, %v562_v62  ;;  %v904_v62 = vld [vmem:[#allocation7 + $0xd0] sm:$0xff] }
  0xda   : > { %v936_v0 = vld [vmem:[#allocation7 + $0x1d0] sm:$0xff] }
  0xdb   : > { %1445 = vmatpush1.bf16.msra.mxu0 %v1444_v9  ;;  %v879_v9 = vld [vmem:[#allocation7 + $0x8] sm:$0xff] }
  0xdc   : > { %1573 = vmatpush1.bf16.msra.mxu1 %v1572_v10  ;;  %1447 = vmatprep.subr.bf16.mxu0 %v1446_v11  ;;  %v910_v10 = vld [vmem:[#allocation7 + $0x100] sm:$0xff]  ;;  %v1626_v11 = vpack.c.bf16 %v927_v4, %v926_v3  ;;  %v1596_v18 = vpack.c.bf16 %v879_v9, %v878_v8  ;;  %v1646_v8 = vpack.c.bf16 %v937_v1, %v936_v0  ;;  %v921_v9 = vld [vmem:[#allocation7 + $0x158] sm:$0xff] }
  0xdd   : > { %1575 = vmatprep.subr.bf16.mxu1 %v1574_v15  ;;  %v928_v15 = vld [vmem:[#allocation7 + $0x190] sm:$0xff]  ;;  %v1628_v19 = vpack.c.bf16 %v911_v12, %v910_v10  ;;  %v906_v10 = vld [vmem:[#allocation7 + $0xe0] sm:$0xff] }
  0xde   : > { %v1630_v24 = vpack.c.bf16 %v929_v16, %v928_v15  ;;  %v938_v12 = vld [vmem:[#allocation7 + $0x1e0] sm:$0xff] }
  0xdf   : > { %1449 = vmatpush1.bf16.msra.mxu0 %v1448_v21  ;;  %v880_v21 = vld [vmem:[#allocation7 + $0x10] sm:$0xff] }
  0xe0   : > { %1577 = vmatpush1.bf16.msra.mxu1 %v1576_v22  ;;  %1451 = vmatprep.subr.bf16.mxu0 %v1450_v23  ;;  %v881_v22 = vld [vmem:[#allocation7 + $0x18] sm:$0xff]  ;;  %v912_v23 = vld [vmem:[#allocation7 + $0x110] sm:$0xff] }
  0xe1   : > { %1579 = vmatprep.subr.bf16.mxu1 %v1578_v27  ;;  %v899_v27 = vld [vmem:[#allocation7 + $0xa8] sm:$0xff]  ;;  %v1600_v30 = vpack.c.bf16 %v881_v22, %v880_v21  ;;  %v1632_v31 = vpack.c.bf16 %v913_v25, %v912_v23  ;;  %v909_v25 = vld [vmem:[#allocation7 + $0xf8] sm:$0xff] }
  0xe2   : > { %v1602_v32 = vpack.c.bf16 %v899_v27, %v898_v26  ;;  %v923_v21 = vld [vmem:[#allocation7 + $0x168] sm:$0xff]  ;;  %v940_v26 = vld [vmem:[#allocation7 + $0x1f0] sm:$0xff] }
  0xe3   : > { %1453 = vmatpush1.bf16.msra.mxu0 %v1452_v33  ;;  %v882_v33 = vld [vmem:[#allocation7 + $0x20] sm:$0xff] }
  0xe4   : > { %1581 = vmatpush1.bf16.msra.mxu1 %v1580_v34  ;;  %1455 = vmatprep.subr.bf16.mxu0 %v1454_v35  ;;  %v883_v34 = vld [vmem:[#allocation7 + $0x28] sm:$0xff]  ;;  %v914_v35 = vld [vmem:[#allocation7 + $0x120] sm:$0xff] }
  0xe5   : > { %1583 = vmatprep.subr.bf16.mxu1 %v1582_v39  ;;  %v901_v39 = vld [vmem:[#allocation7 + $0xb8] sm:$0xff]  ;;  %v1604_v42 = vpack.c.bf16 %v883_v34, %v882_v33  ;;  %v1636_v43 = vpack.c.bf16 %v915_v37, %v914_v35  ;;  %v924_v33 = vld [vmem:[#allocation7 + $0x170] sm:$0xff] }
  0xe6   : > { %v1606_v44 = vpack.c.bf16 %v901_v39, %v900_v38  ;;  %v925_v34 = vld [vmem:[#allocation7 + $0x178] sm:$0xff]  ;;  %v568_v39 = vld [vmem:[%s2239_s2] sm:$0xf] }
  0xe7   : > { %1457 = vmatpush1.bf16.msra.mxu0 %v1456_v45  ;;  %v884_v45 = vld [vmem:[#allocation7 + $0x30] sm:$0xff]  ;;  %v1656_v35 = vpack.c.bf16 %v925_v34, %v924_v33 }
  0xe8   : > { %1585 = vmatpush1.bf16.msra.mxu1 %v1584_v46  ;;  %1459 = vmatprep.subr.bf16.mxu0 %v1458_v47  ;;  %v885_v46 = vld [vmem:[#allocation7 + $0x38] sm:$0xff]  ;;  %v916_v47 = vld [vmem:[#allocation7 + $0x130] sm:$0xff] }
  0xe9   : > { %1587 = vmatprep.subr.bf16.mxu1 %v1586_v51  ;;  %v903_v51 = vld [vmem:[#allocation7 + $0xc8] sm:$0xff]  ;;  %v1608_v54 = vpack.c.bf16 %v885_v46, %v884_v45  ;;  %v1640_v55 = vpack.c.bf16 %v917_v49, %v916_v47 }
  0xea   : > { %v1610_v56 = vpack.c.bf16 %v903_v51, %v902_v50 }
  0xeb   : > { %1461 = vmatpush1.bf16.msra.mxu0 %v1460_v57  ;;  %v886_v57 = vld [vmem:[#allocation7 + $0x40] sm:$0xff] }
  0xec   : > { %1589 = vmatpush1.bf16.msra.mxu1 %v1588_v58  ;;  %1463 = vmatprep.subr.bf16.mxu0 %v1462_v59  ;;  %v887_v58 = vld [vmem:[#allocation7 + $0x48] sm:$0xff]  ;;  %v918_v59 = vld [vmem:[#allocation7 + $0x140] sm:$0xff] }
  0xed   : > { %1591 = vmatprep.subr.bf16.mxu1 %v1590_v63  ;;  %v905_v63 = vld [vmem:[#allocation7 + $0xd8] sm:$0xff]  ;;  %v1612_v2 = vpack.c.bf16 %v887_v58, %v886_v57  ;;  %v1644_v3 = vpack.c.bf16 %v919_v61, %v918_v59 }
  0xee   : > { %v1614_v4 = vpack.c.bf16 %v905_v63, %v904_v62 }
  0xef   : > { %1465 = vmatpush1.bf16.msra.mxu0 %v1464_v5  ;;  %v888_v5 = vld [vmem:[#allocation7 + $0x50] sm:$0xff] }
  0xf0   : > { %1593 = vmatpush1.bf16.msra.mxu1 %v1592_v6  ;;  %1595 = vmatprep.subr.bf16.mxu0 %v1594_v7  ;;  %v889_v6 = vld [vmem:[#allocation7 + $0x58] sm:$0xff]  ;;  %v920_v7 = vld [vmem:[#allocation7 + $0x150] sm:$0xff] }
  0xf1   : > { %1627 = vmatprep.subr.bf16.mxu1 %v1626_v11  ;;  %v907_v11 = vld [vmem:[#allocation7 + $0xe8] sm:$0xff]  ;;  %v1616_v14 = vpack.c.bf16 %v889_v6, %v888_v5  ;;  %v1648_v15 = vpack.c.bf16 %v921_v9, %v920_v7 }
  0xf2   : > { %726 = vmatmul.mubr.f32.vlgmr.msra.gmra.mrb[0].mxu0 %v310_v17  ;;  %v1618_v16 = vpack.c.bf16 %v907_v11, %v906_v10 }
  0xf3   : > { %868 = vmatmul.mubr.f32.vlgmr.msra.gmra.mrb[0].mxu1 %v310_v17  ;;  %1597 = vmatpush3.bf16.msra.mxu0 %v1596_v18  ;;  %v890_v17 = vld [vmem:[#allocation7 + $0x60] sm:$0xff]  ;;  %v891_v18 = vld [vmem:[#allocation7 + $0x68] sm:$0xff] }
  0xf4   : > { %1629 = vmatpush3.bf16.msra.mxu1 %v1628_v19  ;;  %1599 = vmatprep.subr.bf16.mxu0 %v1598_v20  ;;  %v1650_v19 = vpack.c.bf16 %v939_v13, %v938_v12  ;;  %v922_v20 = vld [vmem:[#allocation7 + $0x160] sm:$0xff]  ;;  %v1620_v22 = vpack.c.bf16 %v891_v18, %v890_v17 }
  0xf5   : > { %1631 = vmatprep.subr.bf16.mxu1 %v1630_v24  ;;  %v1652_v23 = vpack.c.bf16 %v923_v21, %v922_v20  ;;  %v908_v24 = vld [vmem:[#allocation7 + $0xf0] sm:$0xff] }
  0xf6   : > { %v1622_v27 = vpack.c.bf16 %v909_v25, %v908_v24 }
  0xf7   : > { %1601 = vmatpush3.bf16.msra.mxu0 %v1600_v30  ;;  %v893_v30 = vld [vmem:[#allocation7 + $0x78] sm:$0xff] }
  0xf8   : > { %1633 = vmatpush3.bf16.msra.mxu1 %v1632_v31  ;;  %1603 = vmatprep.subr.bf16.mxu0 %v1602_v32  ;;  %v1654_v31 = vpack.c.bf16 %v941_v28, %v940_v26  ;;  %v1624_v32 = vpack.c.bf16 %v893_v30, %v892_v29 }
  0xf9   : > { %1635 = vmatprep.subr.bf16.mxu1 %v1634_v36  ;;  %v570_v36 = vlaneseq }
  0xfb   : > { %1605 = vmatpush3.bf16.msra.mxu0 %v1604_v42  ;;  %v571_v37 = vshrl.u32 %v570_v36, 7 }
  0xfc   : > { %1637 = vmatpush3.bf16.msra.mxu1 %v1636_v43  ;;  %1607 = vmatprep.subr.bf16.mxu0 %v1606_v44 }
  0xfd   : > { %1639 = vmatprep.subr.bf16.mxu1 %v1638_v48  ;;  %v572_v38 = vsub.s32 0, %v571_v37  ;;  %v580_v40 = vsub.s32 2, %v571_v37  ;;  %v576_v41 = vsub.s32 1, %v571_v37  ;;  %v584_v42 = vsub.s32 3, %v571_v37 }
  0xff   : > { %1609 = vmatpush3.bf16.msra.mxu0 %v1608_v54  ;;  %v573_v43 = vrot.slane %v568_v39, %v572_v38  ;;  %v581_v44 = vrot.slane %v568_v39, %v580_v40  ;;  %v577_v45 = vrot.slane %v568_v39, %v576_v41  ;;  %v585_v46 = vrot.slane %v568_v39, %v584_v42 }
 0x100   : > { %1641 = vmatpush3.bf16.msra.mxu1 %v1640_v55  ;;  %1611 = vmatprep.subr.bf16.mxu0 %v1610_v56 }
 0x101   : > { %1643 = vmatprep.subr.bf16.mxu1 %v1642_v60 }
 0x103   : > { %1613 = vmatpush3.bf16.msra.mxu0 %v1612_v2 }
 0x104   : > { %1645 = vmatpush3.bf16.msra.mxu1 %v1644_v3  ;;  %1615 = vmatprep.subr.bf16.mxu0 %v1614_v4 }
 0x105   : > { %1647 = vmatprep.subr.bf16.mxu1 %v1646_v8 }
 0x107   : > { %1617 = vmatpush3.bf16.msra.mxu0 %v1616_v14 }
 0x108   : > { %1649 = vmatpush3.bf16.msra.mxu1 %v1648_v15  ;;  %1619 = vmatprep.subr.bf16.mxu0 %v1618_v16 }
 0x109   : > { %1651 = vmatprep.subr.bf16.mxu1 %v1650_v19 }
 0x10b   : > { %1621 = vmatpush3.bf16.msra.mxu0 %v1620_v22 }
 0x10c   : > { %1653 = vmatpush3.bf16.msra.mxu1 %v1652_v23  ;;  %1623 = vmatprep.subr.bf16.mxu0 %v1622_v27 }
 0x10d   : > { %1655 = vmatprep.subr.bf16.mxu1 %v1654_v31 }
 0x10f   : > { %1625 = vmatpush3.bf16.msra.mxu0 %v1624_v32 }
 0x110   : > { %1657 = vmatpush3.bf16.msra.mxu1 %v1656_v35 }
 0x1c5   : > { %v727_v47 = vpop.f32.mrb[0].mxu0 }
 0x1c6   : > { %v1658_v48 = vadd.f32 %v727_v47, %v573_v43  ;;  %v869_v49 = vpop.f32.mrb[0].mxu1  ;;  %v729_v50 = vpop.f32.mrb[1].mxu0 }
 0x1c7   : > { %v1660_v51 = vadd.f32 %v869_v49, %v581_v44  ;;  %v1659_v52 = vadd.f32 %v729_v50, %v577_v45  ;;  %v871_v53 = vpop.f32.mrb[1].mxu1 }
 0x1c8   : > { %874 = vst [vmem:[%s307_s16] sm:$0xff] %v1658_v48  ;;  %v1661_v54 = vadd.f32 %v871_v53, %v585_v46 }
 0x1c9   : > { %876 = vst [vmem:[%s307_s16 + $0x10] sm:$0xff] %v1660_v51  ;;  %875 = vst [vmem:[%s307_s16 + $0x8] sm:$0xff] %v1659_v52  ;;  %1013 = vmatprep.mubr.f32.mxu0 %v1659_v52 }
 0x1ca   : > { %877 = vst [vmem:[%s307_s16 + $0x18] sm:$0xff] %v1661_v54  ;;  %1083 = vmatprep.mubr.f32.mxu1 %v1661_v54  ;;  %1014 = vmatmul.mubr.f32.vlgmr.msra.gmra.mrb[2].mxu0 %v1658_v48 }
 0x1cb   : > { %1084 = vmatmul.mubr.f32.vlgmr.msra.gmra.mrb[2].mxu1 %v1660_v51 }
 0x1cc   : > { %1841 = shalt.err (!%p1838_p7)
}
 0x1cd   : > { %s1842_s10 = scalar_lea.hbm %s2166_s8, 512  ;;  %s1846_s16 = scalar_lea.hbm %s2243_s6, 1536 }
 0x1ce   : > { %p1843_p9 = scmp.ne.s32.totalorder %s2166_s8, %s1842_s10  ;;  %p1847_p0 = scmp.lt.u32.totalorder %s2166_s8, %s2243_s6 }
 0x1cf   : > { %p1848_p10 = scmp.lt.u32.totalorder %s1846_s16, %s1842_s10  ;;  %p1850_p1 = scmp.lt.u32.totalorder %s1842_s10, %s2166_s8 }
 0x1d0   : > { %p1844_p12 = pnand %p1843_p9, %p2091_p6 }
 0x1d1   : > { %p1849_p11 = por %p1848_p10, %p1847_p0 }
 0x1d2   : > { %p1845_p5 = pneg %p1844_p12 }
 0x1d3   : > { %p1851_p2 = por %p1850_p1, %p1849_p11 }
 0x1d5   : > { %p1852_p4 = pnand %p1851_p2, %p1845_p5 }
 0x1d7   : > { %1855 = shalt.err (!%p1852_p4)
}
 0x1d8   : > { %1677 = dma.vmem_to_hbm [thread:$0]  (%p2091_p6), %s1124_s18, 512, %s2166_s8, %s1096_s15   ;;  %v1258_v57 = vld [vmem:[%s2241_s4] ss:$0 sm:$0xff] }
 0x1d9   : > { %s1256_s14 = sshll.u32 %s2137_s20, 3  ;;  %s1261_s9 = sshll.u32 %s1997_s25, 7 }
 0x1da   : > { %s300_s13 = scalar_lea.vmem [#allocation8], %s1256_s14  ;;  %s2194_s8 = scalar_lea.hbm %s2242_s5, %s1261_s9 }
 0x1db   : > { %s1109_s10 = sshll.u32 %s300_s13, 4  ;;  %s1091_s15 = scalar_lea.sflag [#allocation4], %s2137_s20  ;;  %s2196_s10 = int_to_ptr.vmem [resolvable:$true] %s1109_s10 }
 0x1dc   : > { %s1856_s29 = scalar_lea.vmem %s2196_s10, 128  ;;  %s1940_s25 = smov [#allocation8]  }
 0x1dd   : > { %p1857_p8 = scmp.ne.s32.totalorder %s2196_s10, %s1856_s29  ;;  %s1860_s16 = sshll.u32 %s1940_s25, 4  ;;  %s1861_s16 = int_to_ptr.vmem [resolvable:$false] %s1860_s16 }
 0x1de   : > { %s1862_s17 = scalar_lea.vmem %s1861_s16, 256  ;;  %p1863_p7 = scmp.lt.s32.totalorder %s2196_s10, %s1861_s16 }
 0x1df   : > { %p1858_p13 = pnand %p1857_p8, %p2091_p6  ;;  %p1864_p9 = scmp.lt.s32.totalorder %s1862_s17, %s1856_s29 }
 0x1e1   : > { %p1859_p3 = pneg %p1858_p13  ;;  %p1865_p12 = por %p1864_p9, %p1863_p7 }
 0x1e3   : > { %p1866_p5 = pnand %p1865_p12, %p1859_p3 }
 0x29d   : > { %v1300_v55 = vpop.f32.mrb[2].mxu0 }
 0x29e   : > { %v1335_v56 = vpop.f32.mrb[2].mxu1  ;;  %v1301_v58 = vpop.f32.mrb[3].mxu0 }
 0x29f   : > { %v1302_v59 = vadd.f32 %v1301_v58, %v1300_v55  ;;  %v1336_v60 = vpop.f32.mrb[3].mxu1 }
 0x2a0   : > { %v1337_v61 = vadd.f32 %v1336_v60, %v1335_v56 }
 0x2a1   : > { %v1016_v62 = vadd.f32 %v1302_v59, %v1258_v57 }
 0x2a3   : > { %v1086_v63 = vadd.f32 %v1337_v61, %v1016_v62 }
 0x2a5   : > { %1089 = vst [vmem:[%s300_s13] sm:$0xff] %v1086_v63 }
 0x2a6   : > { %1869 = shalt.err (!%p1866_p5)
}
 0x2a7   : > { %s1870_s20 = scalar_lea.hbm %s2194_s8, 128  ;;  %s1874_s7 = scalar_lea.hbm %s2242_s5, 384 }
 0x2a8   : > { %p1871_p0 = scmp.ne.s32.totalorder %s2194_s8, %s1870_s20  ;;  %p1875_p1 = scmp.lt.u32.totalorder %s2194_s8, %s2242_s5 }
 0x2a9   : > { %p1876_p2 = scmp.lt.u32.totalorder %s1874_s7, %s1870_s20  ;;  %p1878_p8 = scmp.lt.u32.totalorder %s1870_s20, %s2194_s8 }
 0x2aa   : > { %p1872_p10 = pnand %p1871_p0, %p2091_p6 }
 0x2ab   : > { %p1877_p4 = por %p1876_p2, %p1875_p1 }
 0x2ac   : > { %p1873_p11 = pneg %p1872_p10 }
 0x2ad   : > { %p1879_p13 = por %p1878_p8, %p1877_p4 }
 0x2af   : > { %p1880_p3 = pnand %p1879_p13, %p1873_p11 }
 0x2b1   : > { %1883 = shalt.err (!%p1880_p3)
}
 0x2b2   : > { %1676 = dma.vmem_to_hbm [thread:$0]  (%p2091_p6), %s2196_s10, 128, %s2194_s8, %s1091_s15  }
 0x2b3 PF: > { %p1703_p7 = scmp.ge.s32.totalorder %s1930_s24, 2  ;;  %s1135_s13 = sand.u32 1, %s1918_s21  }
 0x2b4   : > { %p2258_p9 = scmp.ne.s32.totalorder %s2248_s28, 0  ;;  %s1136_s27 = scalar_lea.sflag [#allocation4], %s1135_s13 }
 0x2b6   : > { %p1692_p12 = pnand %p1703_p7, %p2258_p9 }
 0x2b8   : > { %1909 = dma.done.wait (!%p1692_p12), %s1136_s27, 128  }
 0x2b9   : > { %1911 = vsyncadd (!%p1692_p12), %s1136_s27, 4294967168  ;;  %s1145_s18 = scalar_lea.sflag [#allocation10], %s1135_s13 }
 0x2ba   : > { %1913 = dma.done.wait (!%p1692_p12), %s1145_s18, 512  }
 0x2bb   : > { %1915 = vsyncadd (!%p1692_p12), %s1145_s18, 4294966784  ;;  %p24_p6 = scmp.ge.s32.totalorder %s2078_s26, 5   ;;  %s2259_s21 = smov %s1922_s22 }
 0x2bc   : > { %s2260_s22 = smov %s1926_s23  ;;  %s2261_s23 = smov %s2087_s11 }
 0x2bd   : > { %s2262_s24 = smov %s2078_s26  ;;  %26 = sbr.rel (!%p24_p6) target bundleno = 8 (0x8), region = 110 }
 0x2c4   :  { %1150 = vsyncpa [#allocation3], 1 }
 0x2c5   :  { %1152 = vsyncpa [#allocation3 + $0x1], 1 }
 0x2c6   :  { %1153 = vsyncpa [#allocation6], 1 }
 0x2c7   :  { %1154 = vsyncpa [#allocation4], 1 }
 0x2c8   :  { %1156 = vsyncpa [#allocation4 + $0x1], 1 }
 0x2c9   :  { %1157 = vsyncpa [#allocation10], 1 }
 0x2ca   :  { %1159 = vsyncpa [#allocation10 + $0x1], 1 }

</bundles_post_ra>
